<compile_context>
chip_gen: v7x
topology: tpu7x:2x2x1
jax: 0.10.0
libtpu: 0.0.40
codegen_flags: <defaults>
</compile_context>

<pallas_src>
import math
import functools

import jax
import jax.numpy as jnp
from jax import lax
from jax.experimental import pallas as pl
from jax.experimental.pallas import tpu as pltpu


ROW_TILE_CAP = 512                      # rows (B*T) per block for row-tiled FFN / LayerNorm kernels
FF_TILE_CAP = 1024                      # dff contraction tile for the fused FFN kernel
VMEM_LIMIT_BYTES = 48 * 1024 * 1024     # > 16/32 MiB scoped defaults, < v7x 64 MiB physical
MASK_VALUE = -1e30                      # large finite negative (avoids exp(-inf - -inf) NaNs)


def _cp(*sems):
    return pltpu.CompilerParams(dimension_semantics=tuple(sems),
                                vmem_limit_bytes=VMEM_LIMIT_BYTES)


def _row_plan(n):
    """Return (tile, padded_n): tile divides padded_n; 128-aligned tiles when tiling kicks in."""
    if n <= ROW_TILE_CAP:
        return n, n                                  # single full block (full-dim => layout-legal)
    for t in range(ROW_TILE_CAP, 127, -128):
        if n % t == 0:
            return t, n
    padded = ((n + 127) // 128) * 128                # pad rows instead of one giant block
    for t in range(ROW_TILE_CAP, 127, -128):
        if padded % t == 0:
            return t, padded
    return 128, padded


def _ff_tile(dff):
    if dff <= FF_TILE_CAP:
        return dff
    for t in range(FF_TILE_CAP, 127, -128):
        if dff % t == 0:
            return t
    return dff   # TODO(synk): zero-pad w1 cols / w2 rows when dff has no 128-aligned divisor


# ----------------------------- Pallas kernels -----------------------------

def _attend_project_norm(x, q, k, v, wo_ref, bo_ref, g_ref, beta_ref, o_ref,
                         *, nhead, causal, eps):
    """Shared MHA core: per-head attention folded into the out-projection, + residual + LN.

    x: (T, D) bf16 residual; q: (T, D) bf16 (pre-scaled); k, v: (S, D) bf16.
    """
    t, d = q.shape
    s_len = k.shape[0]
    dh = d // nhead

    if causal:
        row = lax.broadcasted_iota(jnp.int32, (t, s_len), 0)
        col = lax.broadcasted_iota(jnp.int32, (t, s_len), 1)
        neg = jnp.where(col > row, jnp.float32(MASK_VALUE), jnp.float32(0.0))

    acc = jnp.zeros((t, d), jnp.float32)
    for h in range(nhead):                                   # nhead small & static -> unrolled
        sl = slice(h * dh, (h + 1) * dh)
        s = lax.dot_general(q[:, sl], k[:, sl], (((1,), (1,)), ((), ())),
                            preferred_element_type=jnp.float32)          # (T, S) f32
        if causal:
            s = s + neg
        m = jnp.max(s, axis=-1, keepdims=True)
        p = jnp.exp(s - m)
        p = p / jnp.sum(p, axis=-1, keepdims=True)           # exact softmax denominator
        o_h = jnp.dot(p.astype(jnp.bfloat16), v[:, sl],
                      preferred_element_type=jnp.float32)                # (T, dh)
        acc = acc + jnp.dot(o_h.astype(jnp.bfloat16), wo_ref[sl, :],
                            preferred_element_type=jnp.float32)          # fused out-projection
    # TODO(synk): for long sequences convert to flash-style online softmax with a KV-tile grid
    # axis so the full (T, S) f32 score matrix is never materialized (v7x 64 MiB VMEM).

    y = acc + bo_ref[...] + x.astype(jnp.float32)            # residual add in f32
    mu = jnp.mean(y, axis=-1, keepdims=True)
    var = jnp.mean((y - mu) ** 2, axis=-1, keepdims=True)
    o_ref[0] = (((y - mu) * lax.rsqrt(var + eps)) * g_ref[...]
                + beta_ref[...]).astype(o_ref.dtype)


def _self_attn_block_kernel(x_ref, wqkv_ref, bqkv_ref, wo_ref, bo_ref, g_ref, beta_ref,
                            o_ref, *, nhead, d_model, scale, causal, eps):
    # One batch element per grid step: LN1(x + SelfAttn(x)) fully fused.
    x = x_ref[0]                                             # (T, D) bf16
    # Split dots with static weight-ref slices: no (T, 3D) f32 intermediate, no value slicing.
    q = ((jnp.dot(x, wqkv_ref[:, :d_model], preferred_element_type=jnp.float32)
          + bqkv_ref[:, :d_model]) * scale).astype(jnp.bfloat16)
    k = (jnp.dot(x, wqkv_ref[:, d_model:2 * d_model], preferred_element_type=jnp.float32)
         + bqkv_ref[:, d_model:2 * d_model]).astype(jnp.bfloat16)
    v = (jnp.dot(x, wqkv_ref[:, 2 * d_model:], preferred_element_type=jnp.float32)
         + bqkv_ref[:, 2 * d_model:]).astype(jnp.bfloat16)
    _attend_project_norm(x, q, k, v, wo_ref, bo_ref, g_ref, beta_ref, o_ref,
                         nhead=nhead, causal=causal, eps=eps)


def _cross_attn_block_kernel(x_ref, mem_ref, wq_ref, bq_ref, wkv_ref, bkv_ref,
                             wo_ref, bo_ref, g_ref, beta_ref, o_ref,
                             *, nhead, d_model, scale, causal, eps):
    # One batch element per grid step: LN2(x + CrossAttn(x, memory)) fully fused.
    x = x_ref[0]                                             # (T, D) bf16
    mem = mem_ref[0]                                         # (S, D) bf16
    q = ((jnp.dot(x, wq_ref[...], preferred_element_type=jnp.float32)
          + bq_ref[...]) * scale).astype(jnp.bfloat16)
    k = (jnp.dot(mem, wkv_ref[:, :d_model], preferred_element_type=jnp.float32)
         + bkv_ref[:, :d_model]).astype(jnp.bfloat16)
    v = (jnp.dot(mem, wkv_ref[:, d_model:], preferred_element_type=jnp.float32)
         + bkv_ref[:, d_model:]).astype(jnp.bfloat16)
    _attend_project_norm(x, q, k, v, wo_ref, bo_ref, g_ref, beta_ref, o_ref,
                         nhead=nhead, causal=causal, eps=eps)


def _ffn_block_kernel(x_ref, w1_ref, b1_ref, w2_ref, b2_ref, g_ref, beta_ref,
                      o_ref, acc_ref, *, eps):
    # o = LayerNorm(x + relu(x @ W1 + b1) @ W2 + b2); dff contraction tiled over grid axis 1.
    j = pl.program_id(1)

    @pl.when(j == 0)
    def _():
        acc_ref[...] = jnp.zeros_like(acc_ref)

    # x_ref is bf16: feed the MXU directly, no per-tile up/down casts.
    h = jnp.dot(x_ref[...], w1_ref[...], preferred_element_type=jnp.float32) + b1_ref[...]
    h = jnp.maximum(h, 0.0)                                  # ReLU (torch default activation)
    acc_ref[...] += jnp.dot(h.astype(jnp.bfloat16), w2_ref[...],
                            preferred_element_type=jnp.float32)

    @pl.when(j == pl.num_programs(1) - 1)
    def _():
        y = x_ref[...].astype(jnp.float32) + acc_ref[...] + b2_ref[...]   # f32 residual, once
        mu = jnp.mean(y, axis=-1, keepdims=True)
        var = jnp.mean((y - mu) ** 2, axis=-1, keepdims=True)
        o_ref[...] = (((y - mu) * lax.rsqrt(var + eps)) * g_ref[...]
                      + beta_ref[...]).astype(o_ref.dtype)


def _layernorm_kernel(x_ref, g_ref, b_ref, o_ref, *, eps):
    x = x_ref[...].astype(jnp.float32)
    mu = jnp.mean(x, axis=-1, keepdims=True)
    var = jnp.mean((x - mu) ** 2, axis=-1, keepdims=True)
    o_ref[...] = (((x - mu) * lax.rsqrt(var + eps)) * g_ref[...]
                  + b_ref[...]).astype(o_ref.dtype)


# ----------------------------- kernel wrappers -----------------------------
# TODO(synk): on v7x, single-buffer the constant-index-map weight BlockSpecs
# (pipeline_mode=pl.Buffered(1)) and/or fp8-quantize FFN/projection weights to fit 64 MiB VMEM
# at very large D; kept default double-buffering here for maximum compile portability.

def pallas_self_attn_block(x, p, nhead, causal, eps=1e-5):
    b, t, d = x.shape
    scale = 1.0 / math.sqrt(d // nhead)
    return pl.pallas_call(
        functools.partial(_self_attn_block_kernel, nhead=nhead, d_model=d,
                          scale=scale, causal=bool(causal), eps=eps),
        grid=(b,),
        in_specs=[pl.BlockSpec((1, t, d), lambda i: (i, 0, 0)),
                  pl.BlockSpec((d, 3 * d), lambda i: (0, 0)),      # weights: VMEM-resident
                  pl.BlockSpec((1, 3 * d), lambda i: (0, 0)),
                  pl.BlockSpec((d, d), lambda i: (0, 0)),
                  pl.BlockSpec((1, d), lambda i: (0, 0)),
                  pl.BlockSpec((1, d), lambda i: (0, 0)),
                  pl.BlockSpec((1, d), lambda i: (0, 0))],
        out_specs=pl.BlockSpec((1, t, d), lambda i: (i, 0, 0)),
        out_shape=jax.ShapeDtypeStruct((b, t, d), jnp.bfloat16),
        compiler_params=_cp("parallel"),
    )(x, p['sa_wqkv'], p['sa_bqkv'], p['sa_wo'], p['sa_bo'], p['ln1_g'], p['ln1_b'])


def pallas_cross_attn_block(x, mem, p, nhead, causal, eps=1e-5):
    b, t, d = x.shape
    s = mem.shape[1]
    scale = 1.0 / math.sqrt(d // nhead)
    return pl.pallas_call(
        functools.partial(_cross_attn_block_kernel, nhead=nhead, d_model=d,
                          scale=scale, causal=bool(causal), eps=eps),
        grid=(b,),
        in_specs=[pl.BlockSpec((1, t, d), lambda i: (i, 0, 0)),
                  pl.BlockSpec((1, s, d), lambda i: (i, 0, 0)),
                  pl.BlockSpec((d, d), lambda i: (0, 0)),
                  pl.BlockSpec((1, d), lambda i: (0, 0)),
                  pl.BlockSpec((d, 2 * d), lambda i: (0, 0)),
                  pl.BlockSpec((1, 2 * d), lambda i: (0, 0)),
                  pl.BlockSpec((d, d), lambda i: (0, 0)),
                  pl.BlockSpec((1, d), lambda i: (0, 0)),
                  pl.BlockSpec((1, d), lambda i: (0, 0)),
                  pl.BlockSpec((1, d), lambda i: (0, 0))],
        out_specs=pl.BlockSpec((1, t, d), lambda i: (i, 0, 0)),
        out_shape=jax.ShapeDtypeStruct((b, t, d), jnp.bfloat16),
        compiler_params=_cp("parallel"),
    )(x, mem, p['ca_wq'], p['ca_bq'], p['ca_wkv'], p['ca_bkv'],
      p['ca_wo'], p['ca_bo'], p['ln2_g'], p['ln2_b'])


def pallas_ffn_add_ln(x, w1, b1, w2, b2, g, beta, eps=1e-5):
    n, d = x.shape
    dff = w1.shape[1]
    tile, n_pad = _row_plan(n)
    if n_pad != n:
        x = jnp.pad(x, ((0, n_pad - n), (0, 0)))
    ftile = _ff_tile(dff)
    out = pl.pallas_call(
        functools.partial(_ffn_block_kernel, eps=eps),
        grid=(n_pad // tile, dff // ftile),
        in_specs=[pl.BlockSpec((tile, d), lambda i, j: (i, 0)),
                  pl.BlockSpec((d, ftile), lambda i, j: (0, j)),
                  pl.BlockSpec((1, ftile), lambda i, j: (0, j)),
                  pl.BlockSpec((ftile, d), lambda i, j: (j, 0)),
                  pl.BlockSpec((1, d), lambda i, j: (0, 0)),
                  pl.BlockSpec((1, d), lambda i, j: (0, 0)),
                  pl.BlockSpec((1, d), lambda i, j: (0, 0))],
        out_specs=pl.BlockSpec((tile, d), lambda i, j: (i, 0)),
        out_shape=jax.ShapeDtypeStruct((n_pad, d), jnp.bfloat16),
        scratch_shapes=[pltpu.VMEM((tile, d), jnp.float32)],
        compiler_params=_cp("parallel", "arbitrary"),
    )(x, w1, b1, w2, b2, g, beta)
    return out[:n] if n_pad != n else out


def pallas_layernorm(x, g, b, eps=1e-5, out_dtype=None):
    n, d = x.shape
    tile, n_pad = _row_plan(n)
    if n_pad != n:
        x = jnp.pad(x, ((0, n_pad - n), (0, 0)))
    out = pl.pallas_call(
        functools.partial(_layernorm_kernel, eps=eps),
        grid=(n_pad // tile,),
        in_specs=[pl.BlockSpec((tile, d), lambda i: (i, 0)),
                  pl.BlockSpec((1, d), lambda i: (0, 0)),
                  pl.BlockSpec((1, d), lambda i: (0, 0))],
        out_specs=pl.BlockSpec((tile, d), lambda i: (i, 0)),
        out_shape=jax.ShapeDtypeStruct((n_pad, d), out_dtype or x.dtype),
        compiler_params=_cp("parallel"),
    )(x, g, b)
    return out[:n] if n_pad != n else out


# ----------------------------- model glue (plain JAX, under jit) -----------------------------

def decoder_layer(x, mem, p, nhead, tgt_is_causal, memory_is_causal):
    # x: (B, T, D) bf16, mem: (B, S, D) bf16
    b, t, d = x.shape
    x = pallas_self_attn_block(x, p, nhead, tgt_is_causal)
    # TODO(synk): memory_is_causal=True with T != S applies a simple col>row mask which may not
    # match PyTorch's rectangular-causal convention; the module default (False) matches exactly.
    x = pallas_cross_attn_block(x, mem, p, nhead, memory_is_causal)
    x = pallas_ffn_add_ln(x.reshape(b * t, d), p['w1'], p['b1'], p['w2'], p['b2'],
                          p['ln3_g'], p['ln3_b']).reshape(b, t, d)
    return x


@functools.partial(jax.jit, static_argnames=('nhead', 'tgt_is_causal', 'memory_is_causal'))
def _decoder_forward(tgt, memory, params, *, nhead, tgt_is_causal, memory_is_causal):
    out_dtype = tgt.dtype
    # transpose once to (B, T, D)/(B, S, D); inter-kernel activations are bf16 (f32 math in-kernel)
    x = jnp.transpose(tgt, (1, 0, 2)).astype(jnp.bfloat16)
    mem = jnp.transpose(memory, (1, 0, 2)).astype(jnp.bfloat16)
    for layer_p in params['layers']:
        x = decoder_layer(x, mem, layer_p, nhead, tgt_is_causal, memory_is_causal)
    b, t, d = x.shape
    if params.get('norm') is not None:
        x = pallas_layernorm(x.reshape(b * t, d), params['norm']['g'], params['norm']['b'],
                             out_dtype=out_dtype).reshape(b, t, d)
    else:
        x = x.astype(out_dtype)
    return jnp.transpose(x, (1, 0, 2))


def _generate_square_subsequent_mask(sz, dtype=jnp.float32):
    return jnp.triu(jnp.full((sz, sz), -jnp.inf, dtype=dtype), k=1)


def _detect_is_causal_mask(mask, is_causal, size):
    # runs eagerly (outside jit) so bool() is legal; result becomes a static jit argument
    make_causal = is_causal is True
    if is_causal is None and mask is not None:
        sz = size if size is not None else mask.shape[-2]
        comp = _generate_square_subsequent_mask(sz, mask.dtype)
        if mask.shape == comp.shape:
            make_causal = bool(jnp.all(mask == comp))
        else:
            make_causal = False
    return make_causal


def transformer_decoder(tgt, memory, params, nhead,
                        tgt_mask=None, memory_mask=None,
                        memory_key_padding_mask=None,
                        tgt_is_causal=None, memory_is_causal=False):
    # TODO(synk): arbitrary additive memory_mask / memory_key_padding_mask not implemented
    # (the module's default call uses None for both).
    assert memory_mask is None and memory_key_padding_mask is None
    seq_len = tgt.shape[0]                        # batch_first=False -> seq dim is 0
    causal = _detect_is_causal_mask(tgt_mask, tgt_is_causal, seq_len)
    return _decoder_forward(tgt, memory, params,
                            nhead=nhead, tgt_is_causal=bool(causal),
                            memory_is_causal=bool(memory_is_causal))


# ----------------------------- parameters -----------------------------

def _init_mha(key, d):
    ks = jax.random.split(key, 8)
    s = 1.0 / math.sqrt(d)
    u = lambda k, shape: jax.random.uniform(k, shape, jnp.float32, -s, s)
    return {'wq': u(ks[0], (d, d)), 'bq': u(ks[1], (d,)),
            'wk': u(ks[2], (d, d)), 'bk': u(ks[3], (d,)),
            'wv': u(ks[4], (d, d)), 'bv': u(ks[5], (d,)),
            'wo': u(ks[6], (d, d)), 'bo': u(ks[7], (d,))}


def init_decoder_params(key, num_layers, d_model, dff):
    layers = []
    for lk in jax.random.split(key, num_layers):
        ks = jax.random.split(lk, 6)
        s1 = 1.0 / math.sqrt(d_model)
        s2 = 1.0 / math.sqrt(dff)
        layers.append({
            'self_attn': _init_mha(ks[0], d_model),
            'cross_attn': _init_mha(ks[1], d_model),
            'w1': jax.random.uniform(ks[2], (d_model, dff), jnp.float32, -s1, s1),
            'b1': jax.random.uniform(ks[3], (dff,), jnp.float32, -s1, s1),
            'w2': jax.random.uniform(ks[4], (dff, d_model), jnp.float32, -s2, s2),
            'b2': jax.random.uniform(ks[5], (d_model,), jnp.float32, -s2, s2),
            'ln1_g': jnp.ones((d_model,), jnp.float32), 'ln1_b': jnp.zeros((d_model,), jnp.float32),
            'ln2_g': jnp.ones((d_model,), jnp.float32), 'ln2_b': jnp.zeros((d_model,), jnp.float32),
            'ln3_g': jnp.ones((d_model,), jnp.float32), 'ln3_b': jnp.zeros((d_model,), jnp.float32),
        })
    norm = {'g': jnp.ones((d_model,), jnp.float32), 'b': jnp.zeros((d_model,), jnp.float32)}
    return {'layers': layers, 'norm': norm}


def prepare_params(params):
    """One-time prep (outside jit): fuse Q/K/V weights, store matmul weights bf16, biases/LN
    params as f32 row vectors (1, dim).  bf16 weights with f32 accumulation is intentional."""
    bf = lambda a: a.astype(jnp.bfloat16)
    row = lambda a: a.reshape(1, -1).astype(jnp.float32)
    layers = []
    for p in params['layers']:
        sa, ca = p['self_attn'], p['cross_attn']
        layers.append({
            'sa_wqkv': bf(jnp.concatenate([sa['wq'], sa['wk'], sa['wv']], axis=1)),
            'sa_bqkv': row(jnp.concatenate([sa['bq'], sa['bk'], sa['bv']])),
            'sa_wo': bf(sa['wo']), 'sa_bo': row(sa['bo']),
            'ca_wq': bf(ca['wq']), 'ca_bq': row(ca['bq']),
            'ca_wkv': bf(jnp.concatenate([ca['wk'], ca['wv']], axis=1)),
            'ca_bkv': row(jnp.concatenate([ca['bk'], ca['bv']])),
            'ca_wo': bf(ca['wo']), 'ca_bo': row(ca['bo']),
            'w1': bf(p['w1']), 'b1': row(p['b1']),
            'w2': bf(p['w2']), 'b2': row(p['b2']),
            'ln1_g': row(p['ln1_g']), 'ln1_b': row(p['ln1_b']),
            'ln2_g': row(p['ln2_g']), 'ln2_b': row(p['ln2_b']),
            'ln3_g': row(p['ln3_g']), 'ln3_b': row(p['ln3_b']),
        })
    norm = params.get('norm')
    if norm is not None:
        norm = {'g': row(norm['g']), 'b': row(norm['b'])}
    return {'layers': layers, 'norm': norm}


# ----------------------------- main -----------------------------

if __name__ == "__main__":
    d_model, nhead, dff, num_layers = 32, 4, 64, 2
    T, S, B = 8, 10, 2  # tgt len, memory len, batch

    key = jax.random.PRNGKey(0)
    k_tgt, k_mem, k_par = jax.random.split(key, 3)
    tgt = jax.random.normal(k_tgt, (T, B, d_model), jnp.float32)      # (T, B, D)
    memory = jax.random.normal(k_mem, (S, B, d_model), jnp.float32)   # (S, B, D)
    params = prepare_params(init_decoder_params(k_par, num_layers, d_model, dff))

    tgt_mask = _generate_square_subsequent_mask(T)  # causal -> detected eagerly, applied in-kernel

    out = transformer_decoder(tgt, memory, params, nhead, tgt_mask=tgt_mask)
    out = jax.block_until_ready(out)

    assert out.shape == (T, B, d_model), out.shape
    assert bool(jnp.all(jnp.isfinite(out)))
    print("KERNEL_OK")
</pallas_src>

<mosaic_0001>
module attributes {stable_mosaic.version = 11 : i64} {
  func.func @_self_attn_block_kernel(%arg0: i32, %arg1: memref<1x8x32xbf16, #tpu.memory_space<vmem>>, %arg2: memref<32x96xbf16, #tpu.memory_space<vmem>>, %arg3: memref<1x96xf32, #tpu.memory_space<vmem>>, %arg4: memref<32x32xbf16, #tpu.memory_space<vmem>>, %arg5: memref<1x32xf32, #tpu.memory_space<vmem>>, %arg6: memref<1x32xf32, #tpu.memory_space<vmem>>, %arg7: memref<1x32xf32, #tpu.memory_space<vmem>>, %arg8: memref<1x8x32xbf16, #tpu.memory_space<vmem>>) attributes {dimension_semantics = [#tpu.dimension_semantics<parallel>], iteration_bounds = array<i64: 2>, scalar_prefetch = 0 : i64, scratch_operands = 0 : i64, tpu.core_type = #tpu.core_type<tc>, window_params = [{transform_indices = @transform_0, window_bounds = array<i64: 1, 8, 32>}, {pipeline_mode = #tpu.pipeline_mode<synchronous>, transform_indices = @transform_1, window_bounds = array<i64: 32, 96>}, {pipeline_mode = #tpu.pipeline_mode<synchronous>, transform_indices = @transform_2, window_bounds = array<i64: 1, 96>}, {pipeline_mode = #tpu.pipeline_mode<synchronous>, transform_indices = @transform_3, window_bounds = array<i64: 32, 32>}, {pipeline_mode = #tpu.pipeline_mode<synchronous>, transform_indices = @transform_4, window_bounds = array<i64: 1, 32>}, {pipeline_mode = #tpu.pipeline_mode<synchronous>, transform_indices = @transform_5, window_bounds = array<i64: 1, 32>}, {pipeline_mode = #tpu.pipeline_mode<synchronous>, transform_indices = @transform_6, window_bounds = array<i64: 1, 32>}, {transform_indices = @transform_7, window_bounds = array<i64: 1, 8, 32>}]} {
    %c0 = arith.constant 0 : index
    %c0_0 = arith.constant 0 : index
    %c0_1 = arith.constant 0 : index
    %0 = vector.load %arg1[%c0, %c0_0, %c0_1] : memref<1x8x32xbf16, #tpu.memory_space<vmem>>, vector<1x8x32xbf16>
    %1 = vector.shape_cast %0 : vector<1x8x32xbf16> to vector<8x32xbf16>
    %c0_2 = arith.constant 0 : index
    %c0_3 = arith.constant 0 : index
    %2 = vector.load %arg2[%c0_2, %c0_3] : memref<32x96xbf16, #tpu.memory_space<vmem>>, vector<32x32xbf16>
    %cst = arith.constant dense<0.000000e+00> : vector<8x32xf32>
    %3 = tpu.matmul %1, %2, %cst {dimension_numbers = #tpu.dot_dimension_numbers<[1], [0], [0], [1], [0, 0, 1, 1], [], []>} : vector<8x32xbf16>, vector<32x32xbf16>, vector<8x32xf32> -> vector<8x32xf32>
    %c0_4 = arith.constant 0 : index
    %c0_5 = arith.constant 0 : index
    %4 = vector.load %arg3[%c0_4, %c0_5] : memref<1x96xf32, #tpu.memory_space<vmem>>, vector<1x32xf32>
    %5 = vector.broadcast %4 : vector<1x32xf32> to vector<8x32xf32>
    %6 = arith.addf %3, %5 : vector<8x32xf32>
    %cst_6 = arith.constant 0.353553385 : f32
    %7 = vector.broadcast %cst_6 : f32 to vector<8x32xf32>
    %8 = arith.mulf %6, %7 : vector<8x32xf32>
    %9 = arith.truncf %8 : vector<8x32xf32> to vector<8x32xbf16>
    %c0_7 = arith.constant 0 : index
    %c32 = arith.constant 32 : index
    %10 = vector.load %arg2[%c0_7, %c32] : memref<32x96xbf16, #tpu.memory_space<vmem>>, vector<32x32xbf16>
    %cst_8 = arith.constant dense<0.000000e+00> : vector<8x32xf32>
    %11 = tpu.matmul %1, %10, %cst_8 {dimension_numbers = #tpu.dot_dimension_numbers<[1], [0], [0], [1], [0, 0, 1, 1], [], []>} : vector<8x32xbf16>, vector<32x32xbf16>, vector<8x32xf32> -> vector<8x32xf32>
    %c0_9 = arith.constant 0 : index
    %c32_10 = arith.constant 32 : index
    %12 = vector.load %arg3[%c0_9, %c32_10] : memref<1x96xf32, #tpu.memory_space<vmem>>, vector<1x32xf32>
    %13 = vector.broadcast %12 : vector<1x32xf32> to vector<8x32xf32>
    %14 = arith.addf %11, %13 : vector<8x32xf32>
    %15 = arith.truncf %14 : vector<8x32xf32> to vector<8x32xbf16>
    %c0_11 = arith.constant 0 : index
    %c64 = arith.constant 64 : index
    %16 = vector.load %arg2[%c0_11, %c64] : memref<32x96xbf16, #tpu.memory_space<vmem>>, vector<32x32xbf16>
    %cst_12 = arith.constant dense<0.000000e+00> : vector<8x32xf32>
    %17 = tpu.matmul %1, %16, %cst_12 {dimension_numbers = #tpu.dot_dimension_numbers<[1], [0], [0], [1], [0, 0, 1, 1], [], []>} : vector<8x32xbf16>, vector<32x32xbf16>, vector<8x32xf32> -> vector<8x32xf32>
    %c0_13 = arith.constant 0 : index
    %c64_14 = arith.constant 64 : index
    %18 = vector.load %arg3[%c0_13, %c64_14] : memref<1x96xf32, #tpu.memory_space<vmem>>, vector<1x32xf32>
    %19 = vector.broadcast %18 : vector<1x32xf32> to vector<8x32xf32>
    %20 = arith.addf %17, %19 : vector<8x32xf32>
    %21 = arith.truncf %20 : vector<8x32xf32> to vector<8x32xbf16>
    %22 = tpu.iota {dimensions = array<i32: 0>} : vector<8x8xi32>
    %23 = tpu.iota {dimensions = array<i32: 1>} : vector<8x8xi32>
    %24 = arith.cmpi sgt, %23, %22 : vector<8x8xi32>
    %cst_15 = arith.constant -1.000000e+30 : f32
    %cst_16 = arith.constant 0.000000e+00 : f32
    %25 = vector.broadcast %cst_15 : f32 to vector<8x8xf32>
    %26 = vector.broadcast %cst_16 : f32 to vector<8x8xf32>
    %27 = arith.select %24, %25, %26 : vector<8x8xi1>, vector<8x8xf32>
    %cst_17 = arith.constant 0.000000e+00 : f32
    %28 = vector.broadcast %cst_17 : f32 to vector<8x32xf32>
    %29 = vector.extract_strided_slice %9 {offsets = [0, 0], sizes = [8, 8], strides = [1, 1]} : vector<8x32xbf16> to vector<8x8xbf16>
    %30 = vector.extract_strided_slice %15 {offsets = [0, 0], sizes = [8, 8], strides = [1, 1]} : vector<8x32xbf16> to vector<8x8xbf16>
    %cst_18 = arith.constant dense<0.000000e+00> : vector<8x8xf32>
    %31 = tpu.matmul %29, %30, %cst_18 {dimension_numbers = #tpu.dot_dimension_numbers<[1], [1], [0], [0], [0, 0, 1, 0], [], []>} : vector<8x8xbf16>, vector<8x8xbf16>, vector<8x8xf32> -> vector<8x8xf32>
    %32 = arith.addf %31, %27 : vector<8x8xf32>
    %cst_19 = arith.constant dense<0xFF800000> : vector<8xf32>
    %33 = vector.multi_reduction <maximumf>, %32, %cst_19 [1] : vector<8x8xf32> to vector<8xf32>
    %34 = vector.shape_cast %33 : vector<8xf32> to vector<8x1xf32>
    %35 = vector.broadcast %34 : vector<8x1xf32> to vector<8x8xf32>
    %36 = arith.subf %32, %35 : vector<8x8xf32>
    %37 = math.exp %36 : vector<8x8xf32>
    %cst_20 = arith.constant dense<0.000000e+00> : vector<8xf32>
    %38 = vector.multi_reduction <add>, %37, %cst_20 [1] : vector<8x8xf32> to vector<8xf32>
    %39 = vector.shape_cast %38 : vector<8xf32> to vector<8x1xf32>
    %40 = vector.broadcast %39 : vector<8x1xf32> to vector<8x8xf32>
    %41 = arith.divf %37, %40 : vector<8x8xf32>
    %42 = arith.truncf %41 : vector<8x8xf32> to vector<8x8xbf16>
    %43 = vector.extract_strided_slice %21 {offsets = [0, 0], sizes = [8, 8], strides = [1, 1]} : vector<8x32xbf16> to vector<8x8xbf16>
    %cst_21 = arith.constant dense<0.000000e+00> : vector<8x8xf32>
    %44 = tpu.matmul %42, %43, %cst_21 {dimension_numbers = #tpu.dot_dimension_numbers<[1], [0], [0], [1], [0, 0, 1, 1], [], []>} : vector<8x8xbf16>, vector<8x8xbf16>, vector<8x8xf32> -> vector<8x8xf32>
    %45 = arith.truncf %44 : vector<8x8xf32> to vector<8x8xbf16>
    %c0_22 = arith.constant 0 : index
    %c0_23 = arith.constant 0 : index
    %46 = vector.load %arg4[%c0_22, %c0_23] : memref<32x32xbf16, #tpu.memory_space<vmem>>, vector<8x32xbf16>
    %cst_24 = arith.constant dense<0.000000e+00> : vector<8x32xf32>
    %47 = tpu.matmul %45, %46, %cst_24 {dimension_numbers = #tpu.dot_dimension_numbers<[1], [0], [0], [1], [0, 0, 1, 1], [], []>} : vector<8x8xbf16>, vector<8x32xbf16>, vector<8x32xf32> -> vector<8x32xf32>
    %48 = arith.addf %28, %47 : vector<8x32xf32>
    %49 = vector.extract_strided_slice %9 {offsets = [0, 8], sizes = [8, 8], strides = [1, 1]} : vector<8x32xbf16> to vector<8x8xbf16>
    %50 = vector.extract_strided_slice %15 {offsets = [0, 8], sizes = [8, 8], strides = [1, 1]} : vector<8x32xbf16> to vector<8x8xbf16>
    %cst_25 = arith.constant dense<0.000000e+00> : vector<8x8xf32>
    %51 = tpu.matmul %49, %50, %cst_25 {dimension_numbers = #tpu.dot_dimension_numbers<[1], [1], [0], [0], [0, 0, 1, 0], [], []>} : vector<8x8xbf16>, vector<8x8xbf16>, vector<8x8xf32> -> vector<8x8xf32>
    %52 = arith.addf %51, %27 : vector<8x8xf32>
    %cst_26 = arith.constant dense<0xFF800000> : vector<8xf32>
    %53 = vector.multi_reduction <maximumf>, %52, %cst_26 [1] : vector<8x8xf32> to vector<8xf32>
    %54 = vector.shape_cast %53 : vector<8xf32> to vector<8x1xf32>
    %55 = vector.broadcast %54 : vector<8x1xf32> to vector<8x8xf32>
    %56 = arith.subf %52, %55 : vector<8x8xf32>
    %57 = math.exp %56 : vector<8x8xf32>
    %cst_27 = arith.constant dense<0.000000e+00> : vector<8xf32>
    %58 = vector.multi_reduction <add>, %57, %cst_27 [1] : vector<8x8xf32> to vector<8xf32>
    %59 = vector.shape_cast %58 : vector<8xf32> to vector<8x1xf32>
    %60 = vector.broadcast %59 : vector<8x1xf32> to vector<8x8xf32>
    %61 = arith.divf %57, %60 : vector<8x8xf32>
    %62 = arith.truncf %61 : vector<8x8xf32> to vector<8x8xbf16>
    %63 = vector.extract_strided_slice %21 {offsets = [0, 8], sizes = [8, 8], strides = [1, 1]} : vector<8x32xbf16> to vector<8x8xbf16>
    %cst_28 = arith.constant dense<0.000000e+00> : vector<8x8xf32>
    %64 = tpu.matmul %62, %63, %cst_28 {dimension_numbers = #tpu.dot_dimension_numbers<[1], [0], [0], [1], [0, 0, 1, 1], [], []>} : vector<8x8xbf16>, vector<8x8xbf16>, vector<8x8xf32> -> vector<8x8xf32>
    %65 = arith.truncf %64 : vector<8x8xf32> to vector<8x8xbf16>
    %c8 = arith.constant 8 : index
    %c0_29 = arith.constant 0 : index
    %66 = vector.load %arg4[%c8, %c0_29] : memref<32x32xbf16, #tpu.memory_space<vmem>>, vector<8x32xbf16>
    %cst_30 = arith.constant dense<0.000000e+00> : vector<8x32xf32>
    %67 = tpu.matmul %65, %66, %cst_30 {dimension_numbers = #tpu.dot_dimension_numbers<[1], [0], [0], [1], [0, 0, 1, 1], [], []>} : vector<8x8xbf16>, vector<8x32xbf16>, vector<8x32xf32> -> vector<8x32xf32>
    %68 = arith.addf %48, %67 : vector<8x32xf32>
    %69 = vector.extract_strided_slice %9 {offsets = [0, 16], sizes = [8, 8], strides = [1, 1]} : vector<8x32xbf16> to vector<8x8xbf16>
    %70 = vector.extract_strided_slice %15 {offsets = [0, 16], sizes = [8, 8], strides = [1, 1]} : vector<8x32xbf16> to vector<8x8xbf16>
    %cst_31 = arith.constant dense<0.000000e+00> : vector<8x8xf32>
    %71 = tpu.matmul %69, %70, %cst_31 {dimension_numbers = #tpu.dot_dimension_numbers<[1], [1], [0], [0], [0, 0, 1, 0], [], []>} : vector<8x8xbf16>, vector<8x8xbf16>, vector<8x8xf32> -> vector<8x8xf32>
    %72 = arith.addf %71, %27 : vector<8x8xf32>
    %cst_32 = arith.constant dense<0xFF800000> : vector<8xf32>
    %73 = vector.multi_reduction <maximumf>, %72, %cst_32 [1] : vector<8x8xf32> to vector<8xf32>
    %74 = vector.shape_cast %73 : vector<8xf32> to vector<8x1xf32>
    %75 = vector.broadcast %74 : vector<8x1xf32> to vector<8x8xf32>
    %76 = arith.subf %72, %75 : vector<8x8xf32>
    %77 = math.exp %76 : vector<8x8xf32>
    %cst_33 = arith.constant dense<0.000000e+00> : vector<8xf32>
    %78 = vector.multi_reduction <add>, %77, %cst_33 [1] : vector<8x8xf32> to vector<8xf32>
    %79 = vector.shape_cast %78 : vector<8xf32> to vector<8x1xf32>
    %80 = vector.broadcast %79 : vector<8x1xf32> to vector<8x8xf32>
    %81 = arith.divf %77, %80 : vector<8x8xf32>
    %82 = arith.truncf %81 : vector<8x8xf32> to vector<8x8xbf16>
    %83 = vector.extract_strided_slice %21 {offsets = [0, 16], sizes = [8, 8], strides = [1, 1]} : vector<8x32xbf16> to vector<8x8xbf16>
    %cst_34 = arith.constant dense<0.000000e+00> : vector<8x8xf32>
    %84 = tpu.matmul %82, %83, %cst_34 {dimension_numbers = #tpu.dot_dimension_numbers<[1], [0], [0], [1], [0, 0, 1, 1], [], []>} : vector<8x8xbf16>, vector<8x8xbf16>, vector<8x8xf32> -> vector<8x8xf32>
    %85 = arith.truncf %84 : vector<8x8xf32> to vector<8x8xbf16>
    %c16 = arith.constant 16 : index
    %c0_35 = arith.constant 0 : index
    %86 = vector.load %arg4[%c16, %c0_35] : memref<32x32xbf16, #tpu.memory_space<vmem>>, vector<8x32xbf16>
    %cst_36 = arith.constant dense<0.000000e+00> : vector<8x32xf32>
    %87 = tpu.matmul %85, %86, %cst_36 {dimension_numbers = #tpu.dot_dimension_numbers<[1], [0], [0], [1], [0, 0, 1, 1], [], []>} : vector<8x8xbf16>, vector<8x32xbf16>, vector<8x32xf32> -> vector<8x32xf32>
    %88 = arith.addf %68, %87 : vector<8x32xf32>
    %89 = vector.extract_strided_slice %9 {offsets = [0, 24], sizes = [8, 8], strides = [1, 1]} : vector<8x32xbf16> to vector<8x8xbf16>
    %90 = vector.extract_strided_slice %15 {offsets = [0, 24], sizes = [8, 8], strides = [1, 1]} : vector<8x32xbf16> to vector<8x8xbf16>
    %cst_37 = arith.constant dense<0.000000e+00> : vector<8x8xf32>
    %91 = tpu.matmul %89, %90, %cst_37 {dimension_numbers = #tpu.dot_dimension_numbers<[1], [1], [0], [0], [0, 0, 1, 0], [], []>} : vector<8x8xbf16>, vector<8x8xbf16>, vector<8x8xf32> -> vector<8x8xf32>
    %92 = arith.addf %91, %27 : vector<8x8xf32>
    %cst_38 = arith.constant dense<0xFF800000> : vector<8xf32>
    %93 = vector.multi_reduction <maximumf>, %92, %cst_38 [1] : vector<8x8xf32> to vector<8xf32>
    %94 = vector.shape_cast %93 : vector<8xf32> to vector<8x1xf32>
    %95 = vector.broadcast %94 : vector<8x1xf32> to vector<8x8xf32>
    %96 = arith.subf %92, %95 : vector<8x8xf32>
    %97 = math.exp %96 : vector<8x8xf32>
    %cst_39 = arith.constant dense<0.000000e+00> : vector<8xf32>
    %98 = vector.multi_reduction <add>, %97, %cst_39 [1] : vector<8x8xf32> to vector<8xf32>
    %99 = vector.shape_cast %98 : vector<8xf32> to vector<8x1xf32>
    %100 = vector.broadcast %99 : vector<8x1xf32> to vector<8x8xf32>
    %101 = arith.divf %97, %100 : vector<8x8xf32>
    %102 = arith.truncf %101 : vector<8x8xf32> to vector<8x8xbf16>
    %103 = vector.extract_strided_slice %21 {offsets = [0, 24], sizes = [8, 8], strides = [1, 1]} : vector<8x32xbf16> to vector<8x8xbf16>
    %cst_40 = arith.constant dense<0.000000e+00> : vector<8x8xf32>
    %104 = tpu.matmul %102, %103, %cst_40 {dimension_numbers = #tpu.dot_dimension_numbers<[1], [0], [0], [1], [0, 0, 1, 1], [], []>} : vector<8x8xbf16>, vector<8x8xbf16>, vector<8x8xf32> -> vector<8x8xf32>
    %105 = arith.truncf %104 : vector<8x8xf32> to vector<8x8xbf16>
    %c24 = arith.constant 24 : index
    %c0_41 = arith.constant 0 : index
    %106 = vector.load %arg4[%c24, %c0_41] : memref<32x32xbf16, #tpu.memory_space<vmem>>, vector<8x32xbf16>
    %cst_42 = arith.constant dense<0.000000e+00> : vector<8x32xf32>
    %107 = tpu.matmul %105, %106, %cst_42 {dimension_numbers = #tpu.dot_dimension_numbers<[1], [0], [0], [1], [0, 0, 1, 1], [], []>} : vector<8x8xbf16>, vector<8x32xbf16>, vector<8x32xf32> -> vector<8x32xf32>
    %108 = arith.addf %88, %107 : vector<8x32xf32>
    %c0_43 = arith.constant 0 : index
    %c0_44 = arith.constant 0 : index
    %109 = vector.load %arg5[%c0_43, %c0_44] : memref<1x32xf32, #tpu.memory_space<vmem>>, vector<1x32xf32>
    %110 = vector.broadcast %109 : vector<1x32xf32> to vector<8x32xf32>
    %111 = arith.addf %108, %110 : vector<8x32xf32>
    %112 = arith.extf %1 : vector<8x32xbf16> to vector<8x32xf32>
    %113 = arith.addf %111, %112 : vector<8x32xf32>
    %cst_45 = arith.constant dense<0.000000e+00> : vector<8xf32>
    %114 = vector.multi_reduction <add>, %113, %cst_45 [1] : vector<8x32xf32> to vector<8xf32>
    %115 = vector.shape_cast %114 : vector<8xf32> to vector<8x1xf32>
    %cst_46 = arith.constant 3.200000e+01 : f32
    %116 = vector.broadcast %cst_46 : f32 to vector<8x1xf32>
    %117 = arith.divf %115, %116 : vector<8x1xf32>
    %118 = vector.broadcast %117 : vector<8x1xf32> to vector<8x32xf32>
    %119 = arith.subf %113, %118 : vector<8x32xf32>
    %120 = arith.mulf %119, %119 : vector<8x32xf32>
    %cst_47 = arith.constant dense<0.000000e+00> : vector<8xf32>
    %121 = vector.multi_reduction <add>, %120, %cst_47 [1] : vector<8x32xf32> to vector<8xf32>
    %122 = vector.shape_cast %121 : vector<8xf32> to vector<8x1xf32>
    %cst_48 = arith.constant 3.200000e+01 : f32
    %123 = vector.broadcast %cst_48 : f32 to vector<8x1xf32>
    %124 = arith.divf %122, %123 : vector<8x1xf32>
    %125 = vector.broadcast %117 : vector<8x1xf32> to vector<8x32xf32>
    %126 = arith.subf %113, %125 : vector<8x32xf32>
    %cst_49 = arith.constant 9.99999974E-6 : f32
    %127 = vector.broadcast %cst_49 : f32 to vector<8x1xf32>
    %128 = arith.addf %124, %127 : vector<8x1xf32>
    %129 = math.rsqrt %128 : vector<8x1xf32>
    %130 = vector.broadcast %129 : vector<8x1xf32> to vector<8x32xf32>
    %131 = arith.mulf %126, %130 : vector<8x32xf32>
    %c0_50 = arith.constant 0 : index
    %c0_51 = arith.constant 0 : index
    %132 = vector.load %arg6[%c0_50, %c0_51] : memref<1x32xf32, #tpu.memory_space<vmem>>, vector<1x32xf32>
    %133 = vector.broadcast %132 : vector<1x32xf32> to vector<8x32xf32>
    %134 = arith.mulf %131, %133 : vector<8x32xf32>
    %c0_52 = arith.constant 0 : index
    %c0_53 = arith.constant 0 : index
    %135 = vector.load %arg7[%c0_52, %c0_53] : memref<1x32xf32, #tpu.memory_space<vmem>>, vector<1x32xf32>
    %136 = vector.broadcast %135 : vector<1x32xf32> to vector<8x32xf32>
    %137 = arith.addf %134, %136 : vector<8x32xf32>
    %138 = arith.truncf %137 : vector<8x32xf32> to vector<8x32xbf16>
    %c0_54 = arith.constant 0 : index
    %c0_55 = arith.constant 0 : index
    %c0_56 = arith.constant 0 : index
    %139 = vector.load %arg8[%c0_54, %c0_55, %c0_56] : memref<1x8x32xbf16, #tpu.memory_space<vmem>>, vector<1x8x32xbf16>
    %140 = vector.shape_cast %139 : vector<1x8x32xbf16> to vector<8x32xbf16>
    %141 = vector.shape_cast %138 : vector<8x32xbf16> to vector<1x8x32xbf16>
    tpu.vector_store %arg8[%c0_54, %c0_55, %c0_56], %141 {strides = array<i32>} : memref<1x8x32xbf16, #tpu.memory_space<vmem>>, vector<1x8x32xbf16>,
    return
  }
  func.func @transform_0(%arg0: i32) -> (i32, i32, i32) {
    %c0_i32 = arith.constant 0 : i32
    %c0_i32_0 = arith.constant 0 : i32
    %c0_i32_1 = arith.constant 0 : i32
    return %arg0, %c0_i32, %c0_i32_0 : i32, i32, i32
  }
  func.func @transform_1(%arg0: i32) -> (i32, i32) {
    %c0_i32 = arith.constant 0 : i32
    %c0_i32_0 = arith.constant 0 : i32
    %c0_i32_1 = arith.constant 0 : i32
    return %c0_i32, %c0_i32_0 : i32, i32
  }
  func.func @transform_2(%arg0: i32) -> (i32, i32) {
    %c0_i32 = arith.constant 0 : i32
    %c0_i32_0 = arith.constant 0 : i32
    %c0_i32_1 = arith.constant 0 : i32
    return %c0_i32, %c0_i32_0 : i32, i32
  }
  func.func @transform_3(%arg0: i32) -> (i32, i32) {
    %c0_i32 = arith.constant 0 : i32
    %c0_i32_0 = arith.constant 0 : i32
    %c0_i32_1 = arith.constant 0 : i32
    return %c0_i32, %c0_i32_0 : i32, i32
  }
  func.func @transform_4(%arg0: i32) -> (i32, i32) {
    %c0_i32 = arith.constant 0 : i32
    %c0_i32_0 = arith.constant 0 : i32
    %c0_i32_1 = arith.constant 0 : i32
    return %c0_i32, %c0_i32_0 : i32, i32
  }
  func.func @transform_5(%arg0: i32) -> (i32, i32) {
    %c0_i32 = arith.constant 0 : i32
    %c0_i32_0 = arith.constant 0 : i32
    %c0_i32_1 = arith.constant 0 : i32
    return %c0_i32, %c0_i32_0 : i32, i32
  }
  func.func @transform_6(%arg0: i32) -> (i32, i32) {
    %c0_i32 = arith.constant 0 : i32
    %c0_i32_0 = arith.constant 0 : i32
    %c0_i32_1 = arith.constant 0 : i32
    return %c0_i32, %c0_i32_0 : i32, i32
  }
  func.func @transform_7(%arg0: i32) -> (i32, i32, i32) {
    %c0_i32 = arith.constant 0 : i32
    %c0_i32_0 = arith.constant 0 : i32
    %c0_i32_1 = arith.constant 0 : i32
    return %arg0, %c0_i32, %c0_i32_0 : i32, i32, i32
  }
}

module attributes {stable_mosaic.version = 11 : i64} {
  func.func @_ffn_block_kernel(%arg0: i32, %arg1: i32, %arg2: memref<16x32xbf16, #tpu.memory_space<vmem>>, %arg3: memref<32x64xbf16, #tpu.memory_space<vmem>>, %arg4: memref<1x64xf32, #tpu.memory_space<vmem>>, %arg5: memref<64x32xbf16, #tpu.memory_space<vmem>>, %arg6: memref<1x32xf32, #tpu.memory_space<vmem>>, %arg7: memref<1x32xf32, #tpu.memory_space<vmem>>, %arg8: memref<1x32xf32, #tpu.memory_space<vmem>>, %arg9: memref<16x32xbf16, #tpu.memory_space<vmem>>, %arg10: memref<16x32xf32, #tpu.memory_space<vmem>>) attributes {dimension_semantics = [#tpu.dimension_semantics<parallel>, #tpu.dimension_semantics<arbitrary>], iteration_bounds = array<i64: 1, 1>, scalar_prefetch = 0 : i64, scratch_operands = 1 : i64, tpu.core_type = #tpu.core_type<tc>, window_params = [{transform_indices = @transform_0, window_bounds = array<i64: 16, 32>}, {transform_indices = @transform_1, window_bounds = array<i64: 32, 64>}, {transform_indices = @transform_2, window_bounds = array<i64: 1, 64>}, {transform_indices = @transform_3, window_bounds = array<i64: 64, 32>}, {pipeline_mode = #tpu.pipeline_mode<synchronous>, transform_indices = @transform_4, window_bounds = array<i64: 1, 32>}, {pipeline_mode = #tpu.pipeline_mode<synchronous>, transform_indices = @transform_5, window_bounds = array<i64: 1, 32>}, {pipeline_mode = #tpu.pipeline_mode<synchronous>, transform_indices = @transform_6, window_bounds = array<i64: 1, 32>}, {transform_indices = @transform_7, window_bounds = array<i64: 16, 32>}]} {
    %c0_i32 = arith.constant 0 : i32
    %0 = arith.cmpi eq, %arg1, %c0_i32 : i32
    %1 = arith.extui %0 : i1 to i32
    %c0_i32_0 = arith.constant 0 : i32
    %2 = arith.cmpi ne, %1, %c0_i32_0 : i32
    scf.if %2 {
      %cst_16 = arith.constant 0.000000e+00 : f32
      %20 = vector.broadcast %cst_16 : f32 to vector<16x32xf32>
      %c0_17 = arith.constant 0 : index
      %c0_18 = arith.constant 0 : index
      %21 = vector.load %arg10[%c0_17, %c0_18] : memref<16x32xf32, #tpu.memory_space<vmem>>, vector<16x32xf32>
      tpu.vector_store %arg10[%c0_17, %c0_18], %20 {strides = array<i32>} : memref<16x32xf32, #tpu.memory_space<vmem>>, vector<16x32xf32>,
    } else {
    }
    %c0 = arith.constant 0 : index
    %c0_1 = arith.constant 0 : index
    %3 = vector.load %arg2[%c0, %c0_1] : memref<16x32xbf16, #tpu.memory_space<vmem>>, vector<16x32xbf16>
    %c0_2 = arith.constant 0 : index
    %c0_3 = arith.constant 0 : index
    %4 = vector.load %arg3[%c0_2, %c0_3] : memref<32x64xbf16, #tpu.memory_space<vmem>>, vector<32x64xbf16>
    %cst = arith.constant dense<0.000000e+00> : vector<16x64xf32>
    %5 = tpu.matmul %3, %4, %cst {dimension_numbers = #tpu.dot_dimension_numbers<[1], [0], [0], [1], [0, 0, 1, 1], [], []>} : vector<16x32xbf16>, vector<32x64xbf16>, vector<16x64xf32> -> vector<16x64xf32>
    %c0_4 = arith.constant 0 : index
    %c0_5 = arith.constant 0 : index
    %6 = vector.load %arg4[%c0_4, %c0_5] : memref<1x64xf32, #tpu.memory_space<vmem>>, vector<1x64xf32>
    %7 = vector.broadcast %6 : vector<1x64xf32> to vector<16x64xf32>
    %8 = arith.addf %5, %7 : vector<16x64xf32>
    %cst_6 = arith.constant 0.000000e+00 : f32
    %9 = vector.broadcast %cst_6 : f32 to vector<16x64xf32>
    %10 = arith.maximumf %8, %9 : vector<16x64xf32>
    %c0_7 = arith.constant 0 : index
    %c0_8 = arith.constant 0 : index
    %11 = vector.load %arg10[%c0_7, %c0_8] : memref<16x32xf32, #tpu.memory_space<vmem>>, vector<16x32xf32>
    %12 = arith.truncf %10 : vector<16x64xf32> to vector<16x64xbf16>
    %c0_9 = arith.constant 0 : index
    %c0_10 = arith.constant 0 : index
    %13 = vector.load %arg5[%c0_9, %c0_10] : memref<64x32xbf16, #tpu.memory_space<vmem>>, vector<64x32xbf16>
    %cst_11 = arith.constant dense<0.000000e+00> : vector<16x32xf32>
    %14 = tpu.matmul %12, %13, %cst_11 {dimension_numbers = #tpu.dot_dimension_numbers<[1], [0], [0], [1], [0, 0, 1, 1], [], []>} : vector<16x64xbf16>, vector<64x32xbf16>, vector<16x32xf32> -> vector<16x32xf32>
    %15 = arith.addf %11, %14 : vector<16x32xf32>
    %c0_12 = arith.constant 0 : index
    %c0_13 = arith.constant 0 : index
    %16 = vector.load %arg10[%c0_12, %c0_13] : memref<16x32xf32, #tpu.memory_space<vmem>>, vector<16x32xf32>
    tpu.vector_store %arg10[%c0_12, %c0_13], %15 {strides = array<i32>} : memref<16x32xf32, #tpu.memory_space<vmem>>, vector<16x32xf32>,
    %c0_i32_14 = arith.constant 0 : i32
    %17 = arith.cmpi eq, %arg1, %c0_i32_14 : i32
    %18 = arith.extui %17 : i1 to i32
    %c0_i32_15 = arith.constant 0 : i32
    %19 = arith.cmpi ne, %18, %c0_i32_15 : i32
    scf.if %19 {
      %c0_16 = arith.constant 0 : index
      %c0_17 = arith.constant 0 : index
      %20 = vector.load %arg2[%c0_16, %c0_17] : memref<16x32xbf16, #tpu.memory_space<vmem>>, vector<16x32xbf16>
      %21 = arith.extf %20 : vector<16x32xbf16> to vector<16x32xf32>
      %c0_18 = arith.constant 0 : index
      %c0_19 = arith.constant 0 : index
      %22 = vector.load %arg10[%c0_18, %c0_19] : memref<16x32xf32, #tpu.memory_space<vmem>>, vector<16x32xf32>
      %23 = arith.addf %21, %22 : vector<16x32xf32>
      %c0_20 = arith.constant 0 : index
      %c0_21 = arith.constant 0 : index
      %24 = vector.load %arg6[%c0_20, %c0_21] : memref<1x32xf32, #tpu.memory_space<vmem>>, vector<1x32xf32>
      %25 = vector.broadcast %24 : vector<1x32xf32> to vector<16x32xf32>
      %26 = arith.addf %23, %25 : vector<16x32xf32>
      %cst_22 = arith.constant dense<0.000000e+00> : vector<16xf32>
      %27 = vector.multi_reduction <add>, %26, %cst_22 [1] : vector<16x32xf32> to vector<16xf32>
      %28 = vector.shape_cast %27 : vector<16xf32> to vector<16x1xf32>
      %cst_23 = arith.constant 3.200000e+01 : f32
      %29 = vector.broadcast %cst_23 : f32 to vector<16x1xf32>
      %30 = arith.divf %28, %29 : vector<16x1xf32>
      %31 = vector.broadcast %30 : vector<16x1xf32> to vector<16x32xf32>
      %32 = arith.subf %26, %31 : vector<16x32xf32>
      %33 = arith.mulf %32, %32 : vector<16x32xf32>
      %cst_24 = arith.constant dense<0.000000e+00> : vector<16xf32>
      %34 = vector.multi_reduction <add>, %33, %cst_24 [1] : vector<16x32xf32> to vector<16xf32>
      %35 = vector.shape_cast %34 : vector<16xf32> to vector<16x1xf32>
      %cst_25 = arith.constant 3.200000e+01 : f32
      %36 = vector.broadcast %cst_25 : f32 to vector<16x1xf32>
      %37 = arith.divf %35, %36 : vector<16x1xf32>
      %38 = vector.broadcast %30 : vector<16x1xf32> to vector<16x32xf32>
      %39 = arith.subf %26, %38 : vector<16x32xf32>
      %cst_26 = arith.constant 9.99999974E-6 : f32
      %40 = vector.broadcast %cst_26 : f32 to vector<16x1xf32>
      %41 = arith.addf %37, %40 : vector<16x1xf32>
      %42 = math.rsqrt %41 : vector<16x1xf32>
      %43 = vector.broadcast %42 : vector<16x1xf32> to vector<16x32xf32>
      %44 = arith.mulf %39, %43 : vector<16x32xf32>
      %c0_27 = arith.constant 0 : index
      %c0_28 = arith.constant 0 : index
      %45 = vector.load %arg7[%c0_27, %c0_28] : memref<1x32xf32, #tpu.memory_space<vmem>>, vector<1x32xf32>
      %46 = vector.broadcast %45 : vector<1x32xf32> to vector<16x32xf32>
      %47 = arith.mulf %44, %46 : vector<16x32xf32>
      %c0_29 = arith.constant 0 : index
      %c0_30 = arith.constant 0 : index
      %48 = vector.load %arg8[%c0_29, %c0_30] : memref<1x32xf32, #tpu.memory_space<vmem>>, vector<1x32xf32>
      %49 = vector.broadcast %48 : vector<1x32xf32> to vector<16x32xf32>
      %50 = arith.addf %47, %49 : vector<16x32xf32>
      %51 = arith.truncf %50 : vector<16x32xf32> to vector<16x32xbf16>
      %c0_31 = arith.constant 0 : index
      %c0_32 = arith.constant 0 : index
      %52 = vector.load %arg9[%c0_31, %c0_32] : memref<16x32xbf16, #tpu.memory_space<vmem>>, vector<16x32xbf16>
      tpu.vector_store %arg9[%c0_31, %c0_32], %51 {strides = array<i32>} : memref<16x32xbf16, #tpu.memory_space<vmem>>, vector<16x32xbf16>,
    } else {
    }
    return
  }
  func.func @transform_0(%arg0: i32, %arg1: i32) -> (i32, i32) {
    %c0_i32 = arith.constant 0 : i32
    %c0_i32_0 = arith.constant 0 : i32
    return %arg0, %c0_i32 : i32, i32
  }
  func.func @transform_1(%arg0: i32, %arg1: i32) -> (i32, i32) {
    %c0_i32 = arith.constant 0 : i32
    %c0_i32_0 = arith.constant 0 : i32
    return %c0_i32, %arg1 : i32, i32
  }
  func.func @transform_2(%arg0: i32, %arg1: i32) -> (i32, i32) {
    %c0_i32 = arith.constant 0 : i32
    %c0_i32_0 = arith.constant 0 : i32
    return %c0_i32, %arg1 : i32, i32
  }
  func.func @transform_3(%arg0: i32, %arg1: i32) -> (i32, i32) {
    %c0_i32 = arith.constant 0 : i32
    %c0_i32_0 = arith.constant 0 : i32
    return %arg1, %c0_i32 : i32, i32
  }
  func.func @transform_4(%arg0: i32, %arg1: i32) -> (i32, i32) {
    %c0_i32 = arith.constant 0 : i32
    %c0_i32_0 = arith.constant 0 : i32
    %c0_i32_1 = arith.constant 0 : i32
    return %c0_i32, %c0_i32_0 : i32, i32
  }
  func.func @transform_5(%arg0: i32, %arg1: i32) -> (i32, i32) {
    %c0_i32 = arith.constant 0 : i32
    %c0_i32_0 = arith.constant 0 : i32
    %c0_i32_1 = arith.constant 0 : i32
    return %c0_i32, %c0_i32_0 : i32, i32
  }
  func.func @transform_6(%arg0: i32, %arg1: i32) -> (i32, i32) {
    %c0_i32 = arith.constant 0 : i32
    %c0_i32_0 = arith.constant 0 : i32
    %c0_i32_1 = arith.constant 0 : i32
    return %c0_i32, %c0_i32_0 : i32, i32
  }
  func.func @transform_7(%arg0: i32, %arg1: i32) -> (i32, i32) {
    %c0_i32 = arith.constant 0 : i32
    %c0_i32_0 = arith.constant 0 : i32
    return %arg0, %c0_i32 : i32, i32
  }
}

module attributes {stable_mosaic.version = 11 : i64} {
  func.func @_cross_attn_block_kernel(%arg0: i32, %arg1: memref<1x8x32xbf16, #tpu.memory_space<vmem>>, %arg2: memref<1x10x32xbf16, #tpu.memory_space<vmem>>, %arg3: memref<32x32xbf16, #tpu.memory_space<vmem>>, %arg4: memref<1x32xf32, #tpu.memory_space<vmem>>, %arg5: memref<32x64xbf16, #tpu.memory_space<vmem>>, %arg6: memref<1x64xf32, #tpu.memory_space<vmem>>, %arg7: memref<32x32xbf16, #tpu.memory_space<vmem>>, %arg8: memref<1x32xf32, #tpu.memory_space<vmem>>, %arg9: memref<1x32xf32, #tpu.memory_space<vmem>>, %arg10: memref<1x32xf32, #tpu.memory_space<vmem>>, %arg11: memref<1x8x32xbf16, #tpu.memory_space<vmem>>) attributes {dimension_semantics = [#tpu.dimension_semantics<parallel>], iteration_bounds = array<i64: 2>, scalar_prefetch = 0 : i64, scratch_operands = 0 : i64, tpu.core_type = #tpu.core_type<tc>, window_params = [{transform_indices = @transform_0, window_bounds = array<i64: 1, 8, 32>}, {transform_indices = @transform_1, window_bounds = array<i64: 1, 10, 32>}, {pipeline_mode = #tpu.pipeline_mode<synchronous>, transform_indices = @transform_2, window_bounds = array<i64: 32, 32>}, {pipeline_mode = #tpu.pipeline_mode<synchronous>, transform_indices = @transform_3, window_bounds = array<i64: 1, 32>}, {pipeline_mode = #tpu.pipeline_mode<synchronous>, transform_indices = @transform_4, window_bounds = array<i64: 32, 64>}, {pipeline_mode = #tpu.pipeline_mode<synchronous>, transform_indices = @transform_5, window_bounds = array<i64: 1, 64>}, {pipeline_mode = #tpu.pipeline_mode<synchronous>, transform_indices = @transform_6, window_bounds = array<i64: 32, 32>}, {pipeline_mode = #tpu.pipeline_mode<synchronous>, transform_indices = @transform_7, window_bounds = array<i64: 1, 32>}, {pipeline_mode = #tpu.pipeline_mode<synchronous>, transform_indices = @transform_8, window_bounds = array<i64: 1, 32>}, {pipeline_mode = #tpu.pipeline_mode<synchronous>, transform_indices = @transform_9, window_bounds = array<i64: 1, 32>}, {transform_indices = @transform_10, window_bounds = array<i64: 1, 8, 32>}]} {
    %c0 = arith.constant 0 : index
    %c0_0 = arith.constant 0 : index
    %c0_1 = arith.constant 0 : index
    %0 = vector.load %arg1[%c0, %c0_0, %c0_1] : memref<1x8x32xbf16, #tpu.memory_space<vmem>>, vector<1x8x32xbf16>
    %1 = vector.shape_cast %0 : vector<1x8x32xbf16> to vector<8x32xbf16>
    %c0_2 = arith.constant 0 : index
    %c0_3 = arith.constant 0 : index
    %c0_4 = arith.constant 0 : index
    %2 = vector.load %arg2[%c0_2, %c0_3, %c0_4] : memref<1x10x32xbf16, #tpu.memory_space<vmem>>, vector<1x10x32xbf16>
    %3 = vector.shape_cast %2 : vector<1x10x32xbf16> to vector<10x32xbf16>
    %c0_5 = arith.constant 0 : index
    %c0_6 = arith.constant 0 : index
    %4 = vector.load %arg3[%c0_5, %c0_6] : memref<32x32xbf16, #tpu.memory_space<vmem>>, vector<32x32xbf16>
    %cst = arith.constant dense<0.000000e+00> : vector<8x32xf32>
    %5 = tpu.matmul %1, %4, %cst {dimension_numbers = #tpu.dot_dimension_numbers<[1], [0], [0], [1], [0, 0, 1, 1], [], []>} : vector<8x32xbf16>, vector<32x32xbf16>, vector<8x32xf32> -> vector<8x32xf32>
    %c0_7 = arith.constant 0 : index
    %c0_8 = arith.constant 0 : index
    %6 = vector.load %arg4[%c0_7, %c0_8] : memref<1x32xf32, #tpu.memory_space<vmem>>, vector<1x32xf32>
    %7 = vector.broadcast %6 : vector<1x32xf32> to vector<8x32xf32>
    %8 = arith.addf %5, %7 : vector<8x32xf32>
    %cst_9 = arith.constant 0.353553385 : f32
    %9 = vector.broadcast %cst_9 : f32 to vector<8x32xf32>
    %10 = arith.mulf %8, %9 : vector<8x32xf32>
    %11 = arith.truncf %10 : vector<8x32xf32> to vector<8x32xbf16>
    %c0_10 = arith.constant 0 : index
    %c0_11 = arith.constant 0 : index
    %12 = vector.load %arg5[%c0_10, %c0_11] : memref<32x64xbf16, #tpu.memory_space<vmem>>, vector<32x32xbf16>
    %cst_12 = arith.constant dense<0.000000e+00> : vector<10x32xf32>
    %13 = tpu.matmul %3, %12, %cst_12 {dimension_numbers = #tpu.dot_dimension_numbers<[1], [0], [0], [1], [0, 0, 1, 1], [], []>} : vector<10x32xbf16>, vector<32x32xbf16>, vector<10x32xf32> -> vector<10x32xf32>
    %c0_13 = arith.constant 0 : index
    %c0_14 = arith.constant 0 : index
    %14 = vector.load %arg6[%c0_13, %c0_14] : memref<1x64xf32, #tpu.memory_space<vmem>>, vector<1x32xf32>
    %15 = vector.broadcast %14 : vector<1x32xf32> to vector<10x32xf32>
    %16 = arith.addf %13, %15 : vector<10x32xf32>
    %17 = arith.truncf %16 : vector<10x32xf32> to vector<10x32xbf16>
    %c0_15 = arith.constant 0 : index
    %c32 = arith.constant 32 : index
    %18 = vector.load %arg5[%c0_15, %c32] : memref<32x64xbf16, #tpu.memory_space<vmem>>, vector<32x32xbf16>
    %cst_16 = arith.constant dense<0.000000e+00> : vector<10x32xf32>
    %19 = tpu.matmul %3, %18, %cst_16 {dimension_numbers = #tpu.dot_dimension_numbers<[1], [0], [0], [1], [0, 0, 1, 1], [], []>} : vector<10x32xbf16>, vector<32x32xbf16>, vector<10x32xf32> -> vector<10x32xf32>
    %c0_17 = arith.constant 0 : index
    %c32_18 = arith.constant 32 : index
    %20 = vector.load %arg6[%c0_17, %c32_18] : memref<1x64xf32, #tpu.memory_space<vmem>>, vector<1x32xf32>
    %21 = vector.broadcast %20 : vector<1x32xf32> to vector<10x32xf32>
    %22 = arith.addf %19, %21 : vector<10x32xf32>
    %23 = arith.truncf %22 : vector<10x32xf32> to vector<10x32xbf16>
    %cst_19 = arith.constant 0.000000e+00 : f32
    %24 = vector.broadcast %cst_19 : f32 to vector<8x32xf32>
    %25 = vector.extract_strided_slice %11 {offsets = [0, 0], sizes = [8, 8], strides = [1, 1]} : vector<8x32xbf16> to vector<8x8xbf16>
    %26 = vector.extract_strided_slice %17 {offsets = [0, 0], sizes = [10, 8], strides = [1, 1]} : vector<10x32xbf16> to vector<10x8xbf16>
    %cst_20 = arith.constant dense<0.000000e+00> : vector<8x10xf32>
    %27 = tpu.matmul %25, %26, %cst_20 {dimension_numbers = #tpu.dot_dimension_numbers<[1], [1], [0], [0], [0, 0, 1, 0], [], []>} : vector<8x8xbf16>, vector<10x8xbf16>, vector<8x10xf32> -> vector<8x10xf32>
    %cst_21 = arith.constant dense<0xFF800000> : vector<8xf32>
    %28 = vector.multi_reduction <maximumf>, %27, %cst_21 [1] : vector<8x10xf32> to vector<8xf32>
    %29 = vector.shape_cast %28 : vector<8xf32> to vector<8x1xf32>
    %30 = vector.broadcast %29 : vector<8x1xf32> to vector<8x10xf32>
    %31 = arith.subf %27, %30 : vector<8x10xf32>
    %32 = math.exp %31 : vector<8x10xf32>
    %cst_22 = arith.constant dense<0.000000e+00> : vector<8xf32>
    %33 = vector.multi_reduction <add>, %32, %cst_22 [1] : vector<8x10xf32> to vector<8xf32>
    %34 = vector.shape_cast %33 : vector<8xf32> to vector<8x1xf32>
    %35 = vector.broadcast %34 : vector<8x1xf32> to vector<8x10xf32>
    %36 = arith.divf %32, %35 : vector<8x10xf32>
    %37 = arith.truncf %36 : vector<8x10xf32> to vector<8x10xbf16>
    %38 = vector.extract_strided_slice %23 {offsets = [0, 0], sizes = [10, 8], strides = [1, 1]} : vector<10x32xbf16> to vector<10x8xbf16>
    %cst_23 = arith.constant dense<0.000000e+00> : vector<8x8xf32>
    %39 = tpu.matmul %37, %38, %cst_23 {dimension_numbers = #tpu.dot_dimension_numbers<[1], [0], [0], [1], [0, 0, 1, 1], [], []>} : vector<8x10xbf16>, vector<10x8xbf16>, vector<8x8xf32> -> vector<8x8xf32>
    %40 = arith.truncf %39 : vector<8x8xf32> to vector<8x8xbf16>
    %c0_24 = arith.constant 0 : index
    %c0_25 = arith.constant 0 : index
    %41 = vector.load %arg7[%c0_24, %c0_25] : memref<32x32xbf16, #tpu.memory_space<vmem>>, vector<8x32xbf16>
    %cst_26 = arith.constant dense<0.000000e+00> : vector<8x32xf32>
    %42 = tpu.matmul %40, %41, %cst_26 {dimension_numbers = #tpu.dot_dimension_numbers<[1], [0], [0], [1], [0, 0, 1, 1], [], []>} : vector<8x8xbf16>, vector<8x32xbf16>, vector<8x32xf32> -> vector<8x32xf32>
    %43 = arith.addf %24, %42 : vector<8x32xf32>
    %44 = vector.extract_strided_slice %11 {offsets = [0, 8], sizes = [8, 8], strides = [1, 1]} : vector<8x32xbf16> to vector<8x8xbf16>
    %45 = vector.extract_strided_slice %17 {offsets = [0, 8], sizes = [10, 8], strides = [1, 1]} : vector<10x32xbf16> to vector<10x8xbf16>
    %cst_27 = arith.constant dense<0.000000e+00> : vector<8x10xf32>
    %46 = tpu.matmul %44, %45, %cst_27 {dimension_numbers = #tpu.dot_dimension_numbers<[1], [1], [0], [0], [0, 0, 1, 0], [], []>} : vector<8x8xbf16>, vector<10x8xbf16>, vector<8x10xf32> -> vector<8x10xf32>
    %cst_28 = arith.constant dense<0xFF800000> : vector<8xf32>
    %47 = vector.multi_reduction <maximumf>, %46, %cst_28 [1] : vector<8x10xf32> to vector<8xf32>
    %48 = vector.shape_cast %47 : vector<8xf32> to vector<8x1xf32>
    %49 = vector.broadcast %48 : vector<8x1xf32> to vector<8x10xf32>
    %50 = arith.subf %46, %49 : vector<8x10xf32>
    %51 = math.exp %50 : vector<8x10xf32>
    %cst_29 = arith.constant dense<0.000000e+00> : vector<8xf32>
    %52 = vector.multi_reduction <add>, %51, %cst_29 [1] : vector<8x10xf32> to vector<8xf32>
    %53 = vector.shape_cast %52 : vector<8xf32> to vector<8x1xf32>
    %54 = vector.broadcast %53 : vector<8x1xf32> to vector<8x10xf32>
    %55 = arith.divf %51, %54 : vector<8x10xf32>
    %56 = arith.truncf %55 : vector<8x10xf32> to vector<8x10xbf16>
    %57 = vector.extract_strided_slice %23 {offsets = [0, 8], sizes = [10, 8], strides = [1, 1]} : vector<10x32xbf16> to vector<10x8xbf16>
    %cst_30 = arith.constant dense<0.000000e+00> : vector<8x8xf32>
    %58 = tpu.matmul %56, %57, %cst_30 {dimension_numbers = #tpu.dot_dimension_numbers<[1], [0], [0], [1], [0, 0, 1, 1], [], []>} : vector<8x10xbf16>, vector<10x8xbf16>, vector<8x8xf32> -> vector<8x8xf32>
    %59 = arith.truncf %58 : vector<8x8xf32> to vector<8x8xbf16>
    %c8 = arith.constant 8 : index
    %c0_31 = arith.constant 0 : index
    %60 = vector.load %arg7[%c8, %c0_31] : memref<32x32xbf16, #tpu.memory_space<vmem>>, vector<8x32xbf16>
    %cst_32 = arith.constant dense<0.000000e+00> : vector<8x32xf32>
    %61 = tpu.matmul %59, %60, %cst_32 {dimension_numbers = #tpu.dot_dimension_numbers<[1], [0], [0], [1], [0, 0, 1, 1], [], []>} : vector<8x8xbf16>, vector<8x32xbf16>, vector<8x32xf32> -> vector<8x32xf32>
    %62 = arith.addf %43, %61 : vector<8x32xf32>
    %63 = vector.extract_strided_slice %11 {offsets = [0, 16], sizes = [8, 8], strides = [1, 1]} : vector<8x32xbf16> to vector<8x8xbf16>
    %64 = vector.extract_strided_slice %17 {offsets = [0, 16], sizes = [10, 8], strides = [1, 1]} : vector<10x32xbf16> to vector<10x8xbf16>
    %cst_33 = arith.constant dense<0.000000e+00> : vector<8x10xf32>
    %65 = tpu.matmul %63, %64, %cst_33 {dimension_numbers = #tpu.dot_dimension_numbers<[1], [1], [0], [0], [0, 0, 1, 0], [], []>} : vector<8x8xbf16>, vector<10x8xbf16>, vector<8x10xf32> -> vector<8x10xf32>
    %cst_34 = arith.constant dense<0xFF800000> : vector<8xf32>
    %66 = vector.multi_reduction <maximumf>, %65, %cst_34 [1] : vector<8x10xf32> to vector<8xf32>
    %67 = vector.shape_cast %66 : vector<8xf32> to vector<8x1xf32>
    %68 = vector.broadcast %67 : vector<8x1xf32> to vector<8x10xf32>
    %69 = arith.subf %65, %68 : vector<8x10xf32>
    %70 = math.exp %69 : vector<8x10xf32>
    %cst_35 = arith.constant dense<0.000000e+00> : vector<8xf32>
    %71 = vector.multi_reduction <add>, %70, %cst_35 [1] : vector<8x10xf32> to vector<8xf32>
    %72 = vector.shape_cast %71 : vector<8xf32> to vector<8x1xf32>
    %73 = vector.broadcast %72 : vector<8x1xf32> to vector<8x10xf32>
    %74 = arith.divf %70, %73 : vector<8x10xf32>
    %75 = arith.truncf %74 : vector<8x10xf32> to vector<8x10xbf16>
    %76 = vector.extract_strided_slice %23 {offsets = [0, 16], sizes = [10, 8], strides = [1, 1]} : vector<10x32xbf16> to vector<10x8xbf16>
    %cst_36 = arith.constant dense<0.000000e+00> : vector<8x8xf32>
    %77 = tpu.matmul %75, %76, %cst_36 {dimension_numbers = #tpu.dot_dimension_numbers<[1], [0], [0], [1], [0, 0, 1, 1], [], []>} : vector<8x10xbf16>, vector<10x8xbf16>, vector<8x8xf32> -> vector<8x8xf32>
    %78 = arith.truncf %77 : vector<8x8xf32> to vector<8x8xbf16>
    %c16 = arith.constant 16 : index
    %c0_37 = arith.constant 0 : index
    %79 = vector.load %arg7[%c16, %c0_37] : memref<32x32xbf16, #tpu.memory_space<vmem>>, vector<8x32xbf16>
    %cst_38 = arith.constant dense<0.000000e+00> : vector<8x32xf32>
    %80 = tpu.matmul %78, %79, %cst_38 {dimension_numbers = #tpu.dot_dimension_numbers<[1], [0], [0], [1], [0, 0, 1, 1], [], []>} : vector<8x8xbf16>, vector<8x32xbf16>, vector<8x32xf32> -> vector<8x32xf32>
    %81 = arith.addf %62, %80 : vector<8x32xf32>
    %82 = vector.extract_strided_slice %11 {offsets = [0, 24], sizes = [8, 8], strides = [1, 1]} : vector<8x32xbf16> to vector<8x8xbf16>
    %83 = vector.extract_strided_slice %17 {offsets = [0, 24], sizes = [10, 8], strides = [1, 1]} : vector<10x32xbf16> to vector<10x8xbf16>
    %cst_39 = arith.constant dense<0.000000e+00> : vector<8x10xf32>
    %84 = tpu.matmul %82, %83, %cst_39 {dimension_numbers = #tpu.dot_dimension_numbers<[1], [1], [0], [0], [0, 0, 1, 0], [], []>} : vector<8x8xbf16>, vector<10x8xbf16>, vector<8x10xf32> -> vector<8x10xf32>
    %cst_40 = arith.constant dense<0xFF800000> : vector<8xf32>
    %85 = vector.multi_reduction <maximumf>, %84, %cst_40 [1] : vector<8x10xf32> to vector<8xf32>
    %86 = vector.shape_cast %85 : vector<8xf32> to vector<8x1xf32>
    %87 = vector.broadcast %86 : vector<8x1xf32> to vector<8x10xf32>
    %88 = arith.subf %84, %87 : vector<8x10xf32>
    %89 = math.exp %88 : vector<8x10xf32>
    %cst_41 = arith.constant dense<0.000000e+00> : vector<8xf32>
    %90 = vector.multi_reduction <add>, %89, %cst_41 [1] : vector<8x10xf32> to vector<8xf32>
    %91 = vector.shape_cast %90 : vector<8xf32> to vector<8x1xf32>
    %92 = vector.broadcast %91 : vector<8x1xf32> to vector<8x10xf32>
    %93 = arith.divf %89, %92 : vector<8x10xf32>
    %94 = arith.truncf %93 : vector<8x10xf32> to vector<8x10xbf16>
    %95 = vector.extract_strided_slice %23 {offsets = [0, 24], sizes = [10, 8], strides = [1, 1]} : vector<10x32xbf16> to vector<10x8xbf16>
    %cst_42 = arith.constant dense<0.000000e+00> : vector<8x8xf32>
    %96 = tpu.matmul %94, %95, %cst_42 {dimension_numbers = #tpu.dot_dimension_numbers<[1], [0], [0], [1], [0, 0, 1, 1], [], []>} : vector<8x10xbf16>, vector<10x8xbf16>, vector<8x8xf32> -> vector<8x8xf32>
    %97 = arith.truncf %96 : vector<8x8xf32> to vector<8x8xbf16>
    %c24 = arith.constant 24 : index
    %c0_43 = arith.constant 0 : index
    %98 = vector.load %arg7[%c24, %c0_43] : memref<32x32xbf16, #tpu.memory_space<vmem>>, vector<8x32xbf16>
    %cst_44 = arith.constant dense<0.000000e+00> : vector<8x32xf32>
    %99 = tpu.matmul %97, %98, %cst_44 {dimension_numbers = #tpu.dot_dimension_numbers<[1], [0], [0], [1], [0, 0, 1, 1], [], []>} : vector<8x8xbf16>, vector<8x32xbf16>, vector<8x32xf32> -> vector<8x32xf32>
    %100 = arith.addf %81, %99 : vector<8x32xf32>
    %c0_45 = arith.constant 0 : index
    %c0_46 = arith.constant 0 : index
    %101 = vector.load %arg8[%c0_45, %c0_46] : memref<1x32xf32, #tpu.memory_space<vmem>>, vector<1x32xf32>
    %102 = vector.broadcast %101 : vector<1x32xf32> to vector<8x32xf32>
    %103 = arith.addf %100, %102 : vector<8x32xf32>
    %104 = arith.extf %1 : vector<8x32xbf16> to vector<8x32xf32>
    %105 = arith.addf %103, %104 : vector<8x32xf32>
    %cst_47 = arith.constant dense<0.000000e+00> : vector<8xf32>
    %106 = vector.multi_reduction <add>, %105, %cst_47 [1] : vector<8x32xf32> to vector<8xf32>
    %107 = vector.shape_cast %106 : vector<8xf32> to vector<8x1xf32>
    %cst_48 = arith.constant 3.200000e+01 : f32
    %108 = vector.broadcast %cst_48 : f32 to vector<8x1xf32>
    %109 = arith.divf %107, %108 : vector<8x1xf32>
    %110 = vector.broadcast %109 : vector<8x1xf32> to vector<8x32xf32>
    %111 = arith.subf %105, %110 : vector<8x32xf32>
    %112 = arith.mulf %111, %111 : vector<8x32xf32>
    %cst_49 = arith.constant dense<0.000000e+00> : vector<8xf32>
    %113 = vector.multi_reduction <add>, %112, %cst_49 [1] : vector<8x32xf32> to vector<8xf32>
    %114 = vector.shape_cast %113 : vector<8xf32> to vector<8x1xf32>
    %cst_50 = arith.constant 3.200000e+01 : f32
    %115 = vector.broadcast %cst_50 : f32 to vector<8x1xf32>
    %116 = arith.divf %114, %115 : vector<8x1xf32>
    %117 = vector.broadcast %109 : vector<8x1xf32> to vector<8x32xf32>
    %118 = arith.subf %105, %117 : vector<8x32xf32>
    %cst_51 = arith.constant 9.99999974E-6 : f32
    %119 = vector.broadcast %cst_51 : f32 to vector<8x1xf32>
    %120 = arith.addf %116, %119 : vector<8x1xf32>
    %121 = math.rsqrt %120 : vector<8x1xf32>
    %122 = vector.broadcast %121 : vector<8x1xf32> to vector<8x32xf32>
    %123 = arith.mulf %118, %122 : vector<8x32xf32>
    %c0_52 = arith.constant 0 : index
    %c0_53 = arith.constant 0 : index
    %124 = vector.load %arg9[%c0_52, %c0_53] : memref<1x32xf32, #tpu.memory_space<vmem>>, vector<1x32xf32>
    %125 = vector.broadcast %124 : vector<1x32xf32> to vector<8x32xf32>
    %126 = arith.mulf %123, %125 : vector<8x32xf32>
    %c0_54 = arith.constant 0 : index
    %c0_55 = arith.constant 0 : index
    %127 = vector.load %arg10[%c0_54, %c0_55] : memref<1x32xf32, #tpu.memory_space<vmem>>, vector<1x32xf32>
    %128 = vector.broadcast %127 : vector<1x32xf32> to vector<8x32xf32>
    %129 = arith.addf %126, %128 : vector<8x32xf32>
    %130 = arith.truncf %129 : vector<8x32xf32> to vector<8x32xbf16>
    %c0_56 = arith.constant 0 : index
    %c0_57 = arith.constant 0 : index
    %c0_58 = arith.constant 0 : index
    %131 = vector.load %arg11[%c0_56, %c0_57, %c0_58] : memref<1x8x32xbf16, #tpu.memory_space<vmem>>, vector<1x8x32xbf16>
    %132 = vector.shape_cast %131 : vector<1x8x32xbf16> to vector<8x32xbf16>
    %133 = vector.shape_cast %130 : vector<8x32xbf16> to vector<1x8x32xbf16>
    tpu.vector_store %arg11[%c0_56, %c0_57, %c0_58], %133 {strides = array<i32>} : memref<1x8x32xbf16, #tpu.memory_space<vmem>>, vector<1x8x32xbf16>,
    return
  }
  func.func @transform_0(%arg0: i32) -> (i32, i32, i32) {
    %c0_i32 = arith.constant 0 : i32
    %c0_i32_0 = arith.constant 0 : i32
    %c0_i32_1 = arith.constant 0 : i32
    return %arg0, %c0_i32, %c0_i32_0 : i32, i32, i32
  }
  func.func @transform_1(%arg0: i32) -> (i32, i32, i32) {
    %c0_i32 = arith.constant 0 : i32
    %c0_i32_0 = arith.constant 0 : i32
    %c0_i32_1 = arith.constant 0 : i32
    return %arg0, %c0_i32, %c0_i32_0 : i32, i32, i32
  }
  func.func @transform_2(%arg0: i32) -> (i32, i32) {
    %c0_i32 = arith.constant 0 : i32
    %c0_i32_0 = arith.constant 0 : i32
    %c0_i32_1 = arith.constant 0 : i32
    return %c0_i32, %c0_i32_0 : i32, i32
  }
  func.func @transform_3(%arg0: i32) -> (i32, i32) {
    %c0_i32 = arith.constant 0 : i32
    %c0_i32_0 = arith.constant 0 : i32
    %c0_i32_1 = arith.constant 0 : i32
    return %c0_i32, %c0_i32_0 : i32, i32
  }
  func.func @transform_4(%arg0: i32) -> (i32, i32) {
    %c0_i32 = arith.constant 0 : i32
    %c0_i32_0 = arith.constant 0 : i32
    %c0_i32_1 = arith.constant 0 : i32
    return %c0_i32, %c0_i32_0 : i32, i32
  }
  func.func @transform_5(%arg0: i32) -> (i32, i32) {
    %c0_i32 = arith.constant 0 : i32
    %c0_i32_0 = arith.constant 0 : i32
    %c0_i32_1 = arith.constant 0 : i32
    return %c0_i32, %c0_i32_0 : i32, i32
  }
  func.func @transform_6(%arg0: i32) -> (i32, i32) {
    %c0_i32 = arith.constant 0 : i32
    %c0_i32_0 = arith.constant 0 : i32
    %c0_i32_1 = arith.constant 0 : i32
    return %c0_i32, %c0_i32_0 : i32, i32
  }
  func.func @transform_7(%arg0: i32) -> (i32, i32) {
    %c0_i32 = arith.constant 0 : i32
    %c0_i32_0 = arith.constant 0 : i32
    %c0_i32_1 = arith.constant 0 : i32
    return %c0_i32, %c0_i32_0 : i32, i32
  }
  func.func @transform_8(%arg0: i32) -> (i32, i32) {
    %c0_i32 = arith.constant 0 : i32
    %c0_i32_0 = arith.constant 0 : i32
    %c0_i32_1 = arith.constant 0 : i32
    return %c0_i32, %c0_i32_0 : i32, i32
  }
  func.func @transform_9(%arg0: i32) -> (i32, i32) {
    %c0_i32 = arith.constant 0 : i32
    %c0_i32_0 = arith.constant 0 : i32
    %c0_i32_1 = arith.constant 0 : i32
    return %c0_i32, %c0_i32_0 : i32, i32
  }
  func.func @transform_10(%arg0: i32) -> (i32, i32, i32) {
    %c0_i32 = arith.constant 0 : i32
    %c0_i32_0 = arith.constant 0 : i32
    %c0_i32_1 = arith.constant 0 : i32
    return %arg0, %c0_i32, %c0_i32_0 : i32, i32, i32
  }
}

module attributes {stable_mosaic.version = 11 : i64} {
  func.func @_layernorm_kernel(%arg0: i32, %arg1: memref<16x32xbf16, #tpu.memory_space<vmem>>, %arg2: memref<1x32xf32, #tpu.memory_space<vmem>>, %arg3: memref<1x32xf32, #tpu.memory_space<vmem>>, %arg4: memref<16x32xf32, #tpu.memory_space<vmem>>) attributes {dimension_semantics = [#tpu.dimension_semantics<parallel>], iteration_bounds = array<i64: 1>, scalar_prefetch = 0 : i64, scratch_operands = 0 : i64, tpu.core_type = #tpu.core_type<tc>, window_params = [{transform_indices = @transform_0, window_bounds = array<i64: 16, 32>}, {pipeline_mode = #tpu.pipeline_mode<synchronous>, transform_indices = @transform_1, window_bounds = array<i64: 1, 32>}, {pipeline_mode = #tpu.pipeline_mode<synchronous>, transform_indices = @transform_2, window_bounds = array<i64: 1, 32>}, {transform_indices = @transform_3, window_bounds = array<i64: 16, 32>}]} {
    %c0 = arith.constant 0 : index
    %c0_0 = arith.constant 0 : index
    %0 = vector.load %arg1[%c0, %c0_0] : memref<16x32xbf16, #tpu.memory_space<vmem>>, vector<16x32xbf16>
    %1 = arith.extf %0 : vector<16x32xbf16> to vector<16x32xf32>
    %cst = arith.constant dense<0.000000e+00> : vector<16xf32>
    %2 = vector.multi_reduction <add>, %1, %cst [1] : vector<16x32xf32> to vector<16xf32>
    %3 = vector.shape_cast %2 : vector<16xf32> to vector<16x1xf32>
    %cst_1 = arith.constant 3.200000e+01 : f32
    %4 = vector.broadcast %cst_1 : f32 to vector<16x1xf32>
    %5 = arith.divf %3, %4 : vector<16x1xf32>
    %6 = vector.broadcast %5 : vector<16x1xf32> to vector<16x32xf32>
    %7 = arith.subf %1, %6 : vector<16x32xf32>
    %8 = arith.mulf %7, %7 : vector<16x32xf32>
    %cst_2 = arith.constant dense<0.000000e+00> : vector<16xf32>
    %9 = vector.multi_reduction <add>, %8, %cst_2 [1] : vector<16x32xf32> to vector<16xf32>
    %10 = vector.shape_cast %9 : vector<16xf32> to vector<16x1xf32>
    %cst_3 = arith.constant 3.200000e+01 : f32
    %11 = vector.broadcast %cst_3 : f32 to vector<16x1xf32>
    %12 = arith.divf %10, %11 : vector<16x1xf32>
    %13 = vector.broadcast %5 : vector<16x1xf32> to vector<16x32xf32>
    %14 = arith.subf %1, %13 : vector<16x32xf32>
    %cst_4 = arith.constant 9.99999974E-6 : f32
    %15 = vector.broadcast %cst_4 : f32 to vector<16x1xf32>
    %16 = arith.addf %12, %15 : vector<16x1xf32>
    %17 = math.rsqrt %16 : vector<16x1xf32>
    %18 = vector.broadcast %17 : vector<16x1xf32> to vector<16x32xf32>
    %19 = arith.mulf %14, %18 : vector<16x32xf32>
    %c0_5 = arith.constant 0 : index
    %c0_6 = arith.constant 0 : index
    %20 = vector.load %arg2[%c0_5, %c0_6] : memref<1x32xf32, #tpu.memory_space<vmem>>, vector<1x32xf32>
    %21 = vector.broadcast %20 : vector<1x32xf32> to vector<16x32xf32>
    %22 = arith.mulf %19, %21 : vector<16x32xf32>
    %c0_7 = arith.constant 0 : index
    %c0_8 = arith.constant 0 : index
    %23 = vector.load %arg3[%c0_7, %c0_8] : memref<1x32xf32, #tpu.memory_space<vmem>>, vector<1x32xf32>
    %24 = vector.broadcast %23 : vector<1x32xf32> to vector<16x32xf32>
    %25 = arith.addf %22, %24 : vector<16x32xf32>
    %c0_9 = arith.constant 0 : index
    %c0_10 = arith.constant 0 : index
    %26 = vector.load %arg4[%c0_9, %c0_10] : memref<16x32xf32, #tpu.memory_space<vmem>>, vector<16x32xf32>
    tpu.vector_store %arg4[%c0_9, %c0_10], %25 {strides = array<i32>} : memref<16x32xf32, #tpu.memory_space<vmem>>, vector<16x32xf32>,
    return
  }
  func.func @transform_0(%arg0: i32) -> (i32, i32) {
    %c0_i32 = arith.constant 0 : i32
    %c0_i32_0 = arith.constant 0 : i32
    return %arg0, %c0_i32 : i32, i32
  }
  func.func @transform_1(%arg0: i32) -> (i32, i32) {
    %c0_i32 = arith.constant 0 : i32
    %c0_i32_0 = arith.constant 0 : i32
    %c0_i32_1 = arith.constant 0 : i32
    return %c0_i32, %c0_i32_0 : i32, i32
  }
  func.func @transform_2(%arg0: i32) -> (i32, i32) {
    %c0_i32 = arith.constant 0 : i32
    %c0_i32_0 = arith.constant 0 : i32
    %c0_i32_1 = arith.constant 0 : i32
    return %c0_i32, %c0_i32_0 : i32, i32
  }
  func.func @transform_3(%arg0: i32) -> (i32, i32) {
    %c0_i32 = arith.constant 0 : i32
    %c0_i32_0 = arith.constant 0 : i32
    return %arg0, %c0_i32 : i32, i32
  }
}

</mosaic_0001>

<bundles_post_ra>
// kernel: _decoder_forward.13
= control target key start
LH: loop header
LB: loop body
LE: loop exit
PB: predicated region body
PF: predicated region fallthrough
CT: control target
= control target key end

     0   :  { %vm18_vm0 = vcmask 261120   ;;  %s121_s0 = inlined_call_operand.vmem [shape: bf16[16,32], index: 0, kind: input, shape index: {}]   ;;  %s122_s1 = inlined_call_operand.vmem [shape: f32[1,32], index: 1, kind: input, shape index: {}]   ;;  %s123_s2 = inlined_call_operand.vmem [shape: f32[1,32], index: 2, kind: input, shape index: {}]   ;;  %s124_s3 = inlined_call_operand.vmem [shape: f32[16,32], index: 3, kind: output, shape index: {}]  }
   0x1   :  { %v73_v0 = vld [vmem:[%s121_s0] sm:$0xff]  }
   0x2   :  { %v74_v1 = vunpack.c.l.bf16 %v73_v0  ;;  %v75_v2 = vunpack.c.h.bf16 %v73_v0  ;;  %v70_v22 = vld [vmem:[%s122_s1] ss:$0 sm:$0xff] }
   0x3   :  { %v71_v24 = vld [vmem:[%s123_s2] ss:$0 sm:$0xff] }
   0x4   :  { %v19_v3 = vsel %vm18_vm0, %v74_v1, 0.0  ;;  %v22_v4 = vsel %vm18_vm0, %v75_v2, 0.0 }
   0x5   :  { %20 = vadd.xlane.f32.xlu0 %v19_v3 }
   0x9   :  { %23 = vadd.xlane.f32.xlu0 %v22_v4 }
  0x92   :  { %v21_v5 = vpop.xlane.xlu0 %20 }
  0x93   :  { %v26_v6 = vmul.f32 0.03125, %v21_v5 }
  0x95   :  { %v28_v7 = vsub.f32 %v74_v1, %v26_v6 }
  0x96   :  { %v24_v8 = vpop.xlane.xlu0 %23 }
  0x97   :  { %v27_v9 = vmul.f32 0.03125, %v24_v8  ;;  %v30_v10 = vmul.f32 %v28_v7, %v28_v7 }
  0x99   :  { %v29_v11 = vsub.f32 %v75_v2, %v27_v9  ;;  %v32_v12 = vsel %vm18_vm0, %v30_v10, 0.0 }
  0x9a   :  { %33 = vadd.xlane.f32.xlu1 %v32_v12 }
  0x9b   :  { %v31_v13 = vmul.f32 %v29_v11, %v29_v11 }
  0x9d   :  { %v35_v14 = vsel %vm18_vm0, %v31_v13, 0.0 }
  0x9e   :  { %36 = vadd.xlane.f32.xlu1 %v35_v14 }
 0x127   :  { %v34_v15 = vpop.xlane.xlu1 %33 }
 0x128   :  { %v38_v16 = vmul.f32 0.03125, %v34_v15 }
 0x12a   :  { %v40_v17 = vadd.f32 1e-05, %v38_v16 }
 0x12b   :  { %v37_v18 = vpop.xlane.xlu1 %36 }
 0x12c   :  { %76 = vrsqrt.f32 %v40_v17  ;;  %v39_v19 = vmul.f32 0.03125, %v37_v18 }
 0x12e   :  { %v41_v20 = vadd.f32 1e-05, %v39_v19 }
 0x130   :  { %78 = vrsqrt.f32 %v41_v20 }
 0x136   :  { %v77_v21 = vpop.eup %76 }
 0x137   :  { %v44_v23 = vmul.f32 %v77_v21, %v28_v7 }
 0x139   :  { %v53_v25 = vmul.f32 %v70_v22, %v44_v23 }
 0x13a   :  { %v79_v26 = vpop.eup %78 }
 0x13b   :  { %v62_v27 = vadd.f32 %v71_v24, %v53_v25  ;;  %v45_v28 = vmul.f32 %v79_v26, %v29_v11 }
 0x13d   :  { %64 = vst.msk [vmem:[%s124_s3] sm:$0xff] %vm18_vm0, %v62_v27  ;;  %v54_v29 = vmul.f32 %v70_v22, %v45_v28 }
 0x13f   :  { %v63_v30 = vadd.f32 %v71_v24, %v54_v29 }
 0x141   :  { %65 = vst.msk [vmem:[%s124_s3 + $0x8] sm:$0xff] %vm18_vm0, %v63_v30 }

// kernel: _decoder_forward.9
= control target key start
LH: loop header
LB: loop body
LE: loop exit
PB: predicated region body
PF: predicated region fallthrough
CT: control target
= control target key end

     0   :  { %vm31_vm0 = vcmask 261120   ;;  %v337_v0 = vmov 0.0   ;;  %vm338_vm1 = vmmov 0   ;;  %vm146_vm2 = vcmask 523264   ;;  %s430_s1 = inlined_call_operand.vmem [shape: bf16[32,64], index: 1, kind: input, shape index: {}]   ;;  %s431_s3 = inlined_call_operand.vmem [shape: bf16[64,32], index: 3, kind: input, shape index: {}]   ;;  %s432_s0 = inlined_call_operand.vmem [shape: bf16[16,32], index: 0, kind: input, shape index: {}]   ;;  %s433_s2 = inlined_call_operand.vmem [shape: f32[1,64], index: 2, kind: input, shape index: {}]   ;;  %s434_s4 = inlined_call_operand.vmem [shape: f32[1,32], index: 4, kind: input, shape index: {}]   ;;  %s435_s5 = inlined_call_operand.vmem [shape: f32[1,32], index: 5, kind: input, shape index: {}]   ;;  %s436_s6 = inlined_call_operand.vmem [shape: f32[1,32], index: 6, kind: input, shape index: {}]   ;;  %s437_s7 = inlined_call_operand.vmem [shape: bf16[16,32], index: 7, kind: output, shape index: {}]  }
   0x1   :  { %304 = vmatprep.subr.bf16.mxu0 %v337_v0  ;;  %v326_v1 = vld [vmem:[%s430_s1] sm:$0xff]   ;;  %308 = vmatprep.mubr.msk.bf16.mxu0 %vm338_vm1, %v337_v0  ;;  %32 = vst.msk [vmem:[#allocation2] sm:$0xff] %vm31_vm0, %v337_v0  ;;  %33 = vst.msk [vmem:[#allocation2 + $0x8] sm:$0xff] %vm31_vm0, %v337_v0  ;;  %v327_v2 = vld [vmem:[%s430_s1 + $0x8] sm:$0xff]   ;;  %vm268_vm3 = vcmask 257024  }
   0x2   :  { %312 = vmatprep.subr.bf16.mxu1 %v337_v0  ;;  %320 = vmatprep.mubr.msk.bf16.mxu1 %vm338_vm1, %v337_v0  ;;  %v329_v3 = vld [vmem:[%s431_s3] sm:$0xff]   ;;  %v330_v5 = vld [vmem:[%s431_s3 + $0x8] sm:$0xff]   ;;  %v331_v6 = vld [vmem:[%s431_s3 + $0x10] sm:$0xff]  }
   0x3   :  { %305 = vmatpush3.bf16.msra.mxu0 %v326_v1  ;;  %v328_v4 = vld [vmem:[%s432_s0] sm:$0xff]   ;;  %313 = vmatpush3.bf16.msra.mxu1 %v329_v3  ;;  %v332_v7 = vld [vmem:[%s431_s3 + $0x18] sm:$0xff]  }
   0x4   :  { %306 = vmatprep.subr.bf16.mxu0 %v337_v0  ;;  %314 = vmatprep.subr.bf16.mxu1 %v337_v0  ;;  %v275_v8 = vld [vmem:[%s433_s2] ss:$0 sm:$0xff] }
   0x5   :  { %v293_v26 = vld [vmem:[%s432_s0] sm:$0xff]  }
   0x6   :  { %v294_v27 = vunpack.c.l.bf16 %v293_v26  ;;  %v295_v28 = vunpack.c.h.bf16 %v293_v26  ;;  %v285_v30 = vld [vmem:[%s434_s4] ss:$0 sm:$0xff] }
   0x7   :  { %307 = vmatpush3.bf16.msra.mxu0 %v327_v2  ;;  %315 = vmatpush3.bf16.msra.mxu1 %v330_v5  ;;  %v286_v55 = vld [vmem:[%s435_s5] ss:$0 sm:$0xff] }
   0x8   :  { %316 = vmatprep.subr.bf16.mxu1 %v337_v0  ;;  %v111_v18 = vld [vmem:[#allocation2] sm:$0xff]  ;;  %v112_v20 = vld [vmem:[#allocation2 + $0x8] sm:$0xff] }
   0x9   :  { %v287_v57 = vld [vmem:[%s436_s6] ss:$0 sm:$0xff] }
   0xa   :  { %309 = vmatmul.mubr.msk.bf16.vlgmr.msra.gmra.mrb[0].mxu0 %vm31_vm0, %v328_v4 }
   0xb   :  { %317 = vmatpush3.bf16.msra.mxu1 %v331_v6 }
   0xc   :  { %318 = vmatprep.subr.bf16.mxu1 %v337_v0 }
   0xf   :  { %319 = vmatpush3.bf16.msra.mxu1 %v332_v7 }
  0xdd   :  { %v102_v9 = vpop.f32.mrb[0].mxu0 }
  0xde   :  { %v103_v10 = vadd.f32 %v275_v8, %v102_v9  ;;  %v310_v11 = vpop.f32.mrb[1].mxu0 }
  0xdf   :  { %v105_v12 = vpop.f32.mrb[2].mxu0 }
  0xe0   :  { %v106_v13 = vadd.f32 %v275_v8, %v105_v12  ;;  %v311_v14 = vpop.f32.mrb[3].mxu0  ;;  %v109_v15 = vmax.f32 %v103_v10, 0.0 }
  0xe2   :  { %v110_v16 = vmax.f32 %v106_v13, 0.0 }
  0xe4   :  { %v113_v17 = vpack.c.bf16 %v110_v16, %v109_v15 }
  0xe6   :  { %321 = vmatmul.mubr.msk.bf16.vlgmr.msra.gmra.mrb[0].mxu1 %vm146_vm2, %v113_v17 }
 0x1b9   :  { %v184_v19 = vpop.f32.mrb[0].mxu1 }
 0x1ba   :  { %v191_v21 = vadd.f32 %v184_v19, %v111_v18  ;;  %v322_v22 = vpop.f32.mrb[1].mxu1 }
 0x1bb   :  { %v187_v23 = vpop.f32.mrb[2].mxu1 }
 0x1bc   :  { %193 = vst.msk [vmem:[#allocation2] sm:$0xff] %vm31_vm0, %v191_v21  ;;  %v192_v24 = vadd.f32 %v187_v23, %v112_v20  ;;  %v323_v25 = vpop.f32.mrb[3].mxu1 }
 0x1be   :  { %194 = vst.msk [vmem:[#allocation2 + $0x8] sm:$0xff] %vm31_vm0, %v192_v24 }
 0x1c3   :  { %v202_v29 = vld [vmem:[#allocation2] sm:$0xff] }
 0x1c4   :  { %v204_v31 = vadd.f32 %v294_v27, %v202_v29 }
 0x1c5   :  { %v203_v32 = vld [vmem:[#allocation2 + $0x8] sm:$0xff] }
 0x1c6   :  { %v213_v33 = vadd.f32 %v285_v30, %v204_v31  ;;  %v205_v34 = vadd.f32 %v295_v28, %v203_v32 }
 0x1c8   :  { %v215_v35 = vsel %vm31_vm0, %v213_v33, 0.0  ;;  %v214_v36 = vadd.f32 %v285_v30, %v205_v34 }
 0x1c9   :  { %216 = vadd.xlane.f32.xlu0 %v215_v35 }
 0x1ca   :  { %v218_v37 = vsel %vm31_vm0, %v214_v36, 0.0 }
 0x1cd   :  { %219 = vadd.xlane.f32.xlu0 %v218_v37 }
 0x256   :  { %v217_v38 = vpop.xlane.xlu0 %216 }
 0x257   :  { %v222_v39 = vmul.f32 0.03125, %v217_v38 }
 0x259   :  { %v224_v40 = vsub.f32 %v213_v33, %v222_v39 }
 0x25a   :  { %v220_v41 = vpop.xlane.xlu0 %219 }
 0x25b   :  { %v223_v42 = vmul.f32 0.03125, %v220_v41  ;;  %v226_v43 = vmul.f32 %v224_v40, %v224_v40 }
 0x25d   :  { %v225_v44 = vsub.f32 %v214_v36, %v223_v42  ;;  %v228_v45 = vsel %vm31_vm0, %v226_v43, 0.0 }
 0x25e   :  { %229 = vadd.xlane.f32.xlu1 %v228_v45 }
 0x25f   :  { %v227_v46 = vmul.f32 %v225_v44, %v225_v44 }
 0x261   :  { %v231_v47 = vsel %vm31_vm0, %v227_v46, 0.0 }
 0x262   :  { %232 = vadd.xlane.f32.xlu1 %v231_v47 }
 0x2eb   :  { %v230_v48 = vpop.xlane.xlu1 %229 }
 0x2ec   :  { %v234_v49 = vmul.f32 0.03125, %v230_v48 }
 0x2ee   :  { %v236_v50 = vadd.f32 1e-05, %v234_v49 }
 0x2ef   :  { %v233_v51 = vpop.xlane.xlu1 %232 }
 0x2f0   :  { %333 = vrsqrt.f32 %v236_v50  ;;  %v235_v52 = vmul.f32 0.03125, %v233_v51 }
 0x2f2   :  { %v237_v53 = vadd.f32 1e-05, %v235_v52 }
 0x2f4   :  { %335 = vrsqrt.f32 %v237_v53 }
 0x2fa   :  { %v334_v54 = vpop.eup %333 }
 0x2fb   :  { %v240_v56 = vmul.f32 %v334_v54, %v224_v40 }
 0x2fd   :  { %v249_v58 = vmul.f32 %v286_v55, %v240_v56 }
 0x2fe   :  { %v336_v59 = vpop.eup %335 }
 0x2ff   :  { %v258_v60 = vadd.f32 %v287_v57, %v249_v58  ;;  %v241_v61 = vmul.f32 %v336_v59, %v225_v44 }
 0x301   :  { %v290_v62 = vpack.c.bf16 %v258_v60, %v258_v60  ;;  %v250_v63 = vmul.f32 %v286_v55, %v241_v61 }
 0x303   :  { %269 = vst.msk [vmem:[%s437_s7] sm:$0xf] %vm268_vm3, %v290_v62  ;;  %v259_v0 = vadd.f32 %v287_v57, %v250_v63 }
 0x305   :  { %v291_v1 = vpack.c.bf16 %v259_v0, %v259_v0 }
 0x307   :  { %270 = vst.msk [vmem:[%s437_s7 + $0x4] sm:$0xf] %vm268_vm3, %v291_v1 }

// kernel: _decoder_forward.7
= control target key start
LH: loop header
LB: loop body
LE: loop exit
PB: predicated region body
PF: predicated region fallthrough
CT: control target
= control target key end

     0   :  { %s1429_s24 = smov 0   ;;  %s1619_s0 = inlined_call_operand.vmem [shape: bf16[2,8,32], index: 0, kind: input, shape index: {}]   ;;  %s1620_s1 = inlined_call_operand.vmem [shape: bf16[32,96], index: 1, kind: input, shape index: {}]   ;;  %s1621_s2 = inlined_call_operand.vmem [shape: f32[1,96], index: 2, kind: input, shape index: {}]   ;;  %s1622_s3 = inlined_call_operand.vmem [shape: bf16[32,32], index: 3, kind: input, shape index: {}]   ;;  %s1623_s4 = inlined_call_operand.vmem [shape: f32[1,32], index: 4, kind: input, shape index: {}]   ;;  %s1624_s5 = inlined_call_operand.vmem [shape: f32[1,32], index: 5, kind: input, shape index: {}]   ;;  %s1625_s6 = inlined_call_operand.vmem [shape: f32[1,32], index: 6, kind: input, shape index: {}]   ;;  %s1626_s7 = inlined_call_operand.vmem [shape: bf16[2,8,32], index: 7, kind: output, shape index: {}]  }
   0x1 LB: > { %s1180_s25 = sadd.s32 4294967295, %s1380_s24   ;;  %p1184_p0 = scmp.ge.s32.totalorder %s1380_s24, 1  ;;  %s1380_s24 = sphi %s1429_s24, %s17_s24  }
   0x2   : > { %p236_p1 = scmp.lt.s32.totalorder %s1380_s24, 3 }
   0x4   : > { %p237_p2 = pnand %p1184_p0, %p236_p1 }
   0x5   : > { %v1354_v0 = vld [vmem:[%s1620_s1] sm:$0xff] (!%p237_p2)   ;;  %s1382_s28 = smov (!%p237_p2), 96   ;;  %v1355_v1 = vld [vmem:[%s1620_s1 + $0x8] sm:$0xff] (!%p237_p2)   ;;  %v1383_v2 = vmov (!%p237_p2), 0.0   ;;  %p266_p3 = scmp.lt.s32.totalorder (!%p237_p2), %s1180_s25, 1  ;;  %vm1384_vm0 = vmmov (!%p237_p2), 0   ;;  %v445_v27 = vlaneseq (!%p237_p2) }
   0x6   : > { %240 = sbr.rel (%p237_p2) target bundleno = 3035 (0xbdb), region = 48  ;;  %345 = vrot.lane.b32.xlu0 (!%p237_p2), %v1354_v0, %s1382_s28  ;;  %1251 = vmatprep.subr.bf16.mxu1 (!%p237_p2), %v1383_v2  ;;  %v1447_v3 = vld [vmem:[%s1621_s2] ss:$0 sm:$0xff] (!%p237_p2)  ;;  %vm299_vm1 = vcmask (!%p237_p2), 261120   ;;  %s1385_s14 = smov (!%p237_p2), 120   ;;  %vm451_vm2 = vcmask (!%p237_p2), 64512  }
   0x7   : > { %1243 = vmatprep.subr.bf16.mxu0 (!%p237_p2), %v1383_v2  ;;  %1255 = vmatprep.mubr.msk.bf16.mxu1 (!%p237_p2), %vm1384_vm0, %v1383_v2  ;;  %s1386_s15 = smov (!%p237_p2), 64   ;;  %v446_v28 = vshrl.u32 (!%p237_p2), %v445_v27, 7  ;;  %v448_v29 = vand.u32 (!%p237_p2), 127, %v445_v27  ;;  %s1387_s16 = smov (!%p237_p2), 112   ;;  %vm513_vm4 = vcmask (!%p237_p2), 1043456   ;;  %vm1125_vm5 = vcmask (!%p237_p2), 257024  }
   0x8   : > { %1244 = vmatpush3.bf16.msra.mxu0 (!%p237_p2), %v1354_v0  ;;  %1247 = vmatprep.mubr.msk.bf16.mxu0 (!%p237_p2), %vm1384_vm0, %v1383_v2  ;;  %s1388_s21 = smov (!%p237_p2), 104  }
   0x9   : > { %1245 = vmatprep.subr.bf16.mxu0 (!%p237_p2), %v1383_v2  ;;  %351 = vrot.lane.b32.xlu1 (!%p237_p2), %v1447_v3, %s1382_s28  ;;  %vm449_vm3 = vcmp.gt.s32.totalorder (!%p237_p2), %v448_v29, %v446_v28 }
   0xa   : > { %347 = vrot.lane.b32.xlu0 (!%p237_p2), %v1355_v1, %s1382_s28  ;;  %v1507_v30 = vsel (!%p237_p2), %vm449_vm3, -1e+30, %v1383_v2 }
   0xc   : > { %1246 = vmatpush3.bf16.msra.mxu0 (!%p237_p2), %v1355_v1 }
   0xd   : > { %s1628_s25 = smov (!%p266_p3, %s1180_s25), 1  ;;  %1259 = vmatprep.subr.bf16.mxu0 %v1383_v2 }
   0xe   : > { %s1185_s10 = sshll.u32 %s1628_s25, 2 }
   0xf   : > { %s269_s13 = scalar_lea.vmem %s1619_s0, %s1185_s10 }
  0x10   : > { %v1465_v4 = vld [vmem:[%s269_s13] sm:$0xf] }
  0x11   : > { %1248 = vmatmul.mubr.msk.bf16.vlgmr.msra.gmra.mrb[0].mxu0 %vm299_vm1, %v1465_v4 }
  0x12   : > { %1263 = vmatprep.mubr.msk.bf16.mxu0 %vm1384_vm0, %v1383_v2 }
  0x78   : > { %v346_v5 = vpop.permute.xlu0 %345 }
  0x79   : > { %1252 = vmatpush3.bf16.msra.mxu1 %v346_v5 }
  0x7a   : > { %1253 = vmatprep.subr.bf16.mxu1 %v1383_v2 }
  0x7b   : > { %v352_v14 = vpop.permute.xlu1 %351 }
  0x7c   : > { %v348_v6 = vpop.permute.xlu0 %347 }
  0x7d   : > { %1254 = vmatpush3.bf16.msra.mxu1 %v348_v6 }
  0x7e   : > { %1267 = vmatprep.subr.bf16.mxu1 %v1383_v2 }
  0x80   : > { %1256 = vmatmul.mubr.msk.bf16.vlgmr.msra.gmra.mrb[0].mxu1 %vm299_vm1, %v1465_v4 }
  0x81   : > { %1269 = vmatprep.mubr.msk.bf16.mxu1 %vm1384_vm0, %v1383_v2 }
  0xe4   : > { %v337_v7 = vpop.f32.mrb[0].mxu0 }
  0xe5   : > { %v338_v8 = vadd.f32 %v1447_v3, %v337_v7  ;;  %v1249_v9 = vpop.f32.mrb[1].mxu0 }
  0xe6   : > { %v340_v10 = vpop.f32.mrb[2].mxu0  ;;  %v558_v9 = vld [vmem:[%s1622_s3] sm:$0xf] }
  0xe7   : > { %v343_v11 = vmul.f32 0.35355338, %v338_v8  ;;  %v1250_v12 = vpop.f32.mrb[3].mxu0 }
  0xe8   : > { %v724_v12 = vsel %vm513_vm4, %v558_v9, 0 }
  0xe9   : > { %v1478_v13 = vpack.c.bf16 %v343_v11, %v343_v11 }
  0xeb   : > { %560 = vrot.lane.b32.xlu0 %v1478_v13, %s1385_s14 }
  0xef   : > { %397 = vrot.lane.b32.xlu0 %v1355_v1, %s1386_s15  ;;  %v673_v1 = vld [vmem:[%s1622_s3 + $0x4] sm:$0xf] }
 0x153   : > { %v388_v15 = vpop.f32.mrb[0].mxu1 }
 0x154   : > { %v389_v16 = vadd.f32 %v388_v15, %v352_v14  ;;  %v1257_v17 = vpop.f32.mrb[1].mxu1 }
 0x155   : > { %v391_v18 = vpop.f32.mrb[2].mxu1 }
 0x156   : > { %v1483_v19 = vpack.c.bf16 %v389_v16, %v389_v16  ;;  %v1258_v20 = vpop.f32.mrb[3].mxu1 }
 0x158   : > { %563 = vrot.lane.b32.xlu1 %v1483_v19, %s1385_s14  ;;  %v456_v21 = vsel %vm451_vm2, %v1483_v19, 0 }
 0x159   : > { %1268 = vmatpush3.bf16.xpose.msra.mxu1 %v456_v21 }
 0x15a   : > { %1279 = vmatprep.subr.bf16.mxu1 %v1383_v2 }
 0x15c   : > { %395 = vrot.lane.b32.xlu1 %v1354_v0, %s1386_s15 }
 0x15d   : > { %v561_v24 = vpop.permute.xlu0 %560 }
 0x160   : > { %1270 = vmatmul.mubr.msk.bf16.vlgmr.msra.gmra.mrb[4].mxu1 %vm451_vm2, %v1478_v13 }
 0x161   : > { %1281 = vmatprep.mubr.msk.bf16.mxu1 %vm1384_vm0, %v1383_v2  ;;  %v398_v26 = vpop.permute.xlu0 %397 }
 0x1ca   : > { %v564_v22 = vpop.permute.xlu1 %563 }
 0x1cb   : > { %v569_v23 = vsel %vm451_vm2, %v564_v22, 0 }
 0x1cc   : > { %1280 = vmatpush3.bf16.xpose.msra.mxu1 %v569_v23 }
 0x1cd   : > { %1291 = vmatprep.subr.bf16.mxu1 %v1383_v2 }
 0x1ce   : > { %v396_v25 = vpop.permute.xlu1 %395 }
 0x1cf   : > { %1260 = vmatpush3.bf16.msra.mxu0 %v396_v25 }
 0x1d0   : > { %1261 = vmatprep.subr.bf16.mxu0 %v1383_v2 }
 0x1d3   : > { %1282 = vmatmul.mubr.msk.bf16.vlgmr.msra.gmra.mrb[8].mxu1 %vm451_vm2, %v561_v24  ;;  %1262 = vmatpush3.bf16.msra.mxu0 %v398_v26 }
 0x1d4   : > { %1273 = vmatprep.subr.bf16.mxu0 %v1383_v2  ;;  %1293 = vmatprep.mubr.msk.bf16.mxu1 %vm1384_vm0, %v1383_v2 }
 0x1d6   : > { %1264 = vmatmul.mubr.msk.bf16.vlgmr.msra.gmra.mrb[4].mxu0 %vm299_vm1, %v1465_v4 }
 0x1d7   : > { %1275 = vmatprep.mubr.msk.bf16.mxu0 %vm1384_vm0, %v1383_v2 }
 0x233   : > { %v492_v31 = vpop.f32.mrb[4].mxu1 }
 0x234   : > { %v493_v32 = vadd.f32 %v492_v31, %v1507_v30  ;;  %v1271_v33 = vpop.f32.mrb[5].mxu1 }
 0x235   : > { %v495_v34 = vpop.f32.mrb[6].mxu1 }
 0x236   : > { %v1272_v35 = vpop.f32.mrb[7].mxu1  ;;  %v498_v36 = vsel %vm451_vm2, %v493_v32, -inf }
 0x237   : > { %499 = vmax.xlane.f32.xlu1 %v498_v36 }
 0x2a6   : > { %v605_v37 = vpop.f32.mrb[8].mxu1 }
 0x2a7   : > { %v606_v38 = vadd.f32 %v605_v37, %v1507_v30  ;;  %v1283_v39 = vpop.f32.mrb[9].mxu1 }
 0x2a8   : > { %v608_v40 = vpop.f32.mrb[10].mxu1 }
 0x2a9   : > { %v1284_v41 = vpop.f32.mrb[11].mxu1  ;;  %v611_v42 = vsel %vm451_vm2, %v606_v38, -inf  ;;  %v438_v48 = vpop.f32.mrb[4].mxu0 }
 0x2aa   : > { %612 = vmax.xlane.f32.xlu0 %v611_v42  ;;  %v1265_v49 = vpop.f32.mrb[5].mxu0 }
 0x2ab   : > { %v441_v50 = vpop.f32.mrb[6].mxu0 }
 0x2ac   : > { %v1266_v51 = vpop.f32.mrb[7].mxu0 }
 0x2c0   : > { %401 = vrot.lane.b32.xlu0 %v1447_v3, %s1386_s15  ;;  %v678_v3 = vsel %vm513_vm4, %v673_v1, 0 }
 0x2c1   : > { %1292 = vmatpush3.bf16.msra.mxu1 %v678_v3 }
 0x2c2   : > { %1303 = vmatprep.subr.bf16.mxu1 %v1383_v2 }
 0x2c4   : > { %v500_v43 = vpop.xlane.xlu1 %499  ;;  %768 = vrot.lane.b32.xlu0 %v1483_v19, %s1387_s16 }
 0x2c5   : > { %v501_v44 = vsub.f32 %v493_v32, %v500_v43 }
 0x2c7   : > { %v502_v45 = vmul.f32 1.442695, %v501_v44 }
 0x2c8   : > { %766 = vrot.lane.b32.xlu0 %v1478_v13, %s1387_s16 }
 0x2c9   : > { %1356 = vpow2.f32 %v502_v45 }
 0x2d3   : > { %v1357_v46 = vpop.eup %1356 }
 0x2d4   : > { %v504_v47 = vsel %vm451_vm2, %v1357_v46, 0.0 }
 0x2d5   : > { %505 = vadd.xlane.f32.xlu1 %v504_v47 }
 0x337   : > { %v613_v52 = vpop.xlane.xlu0 %612 }
 0x338   : > { %v614_v53 = vsub.f32 %v606_v38, %v613_v52 }
 0x33a   : > { %v615_v54 = vmul.f32 1.442695, %v614_v53 }
 0x33b   : > { %v402_v55 = vpop.permute.xlu0 %401 }
 0x33c   : > { %1358 = vpow2.f32 %v615_v54  ;;  %v439_v56 = vadd.f32 %v438_v48, %v402_v55 }
 0x33e   : > { %v1520_v57 = vpack.c.bf16 %v439_v56, %v439_v56  ;;  %v877_v56 = vld [vmem:[%s1622_s3 + $0x8] sm:$0xf] }
 0x33f   : > { %v769_v20 = vpop.permute.xlu0 %768 }
 0x340   : > { %v515_v58 = vsel %vm513_vm4, %v1520_v57, 0  ;;  %v774_v25 = vsel %vm451_vm2, %v769_v20, 0 }
 0x341   : > { %1274 = vmatpush3.bf16.msra.mxu0 %v515_v58  ;;  %v882_v58 = vsel %vm513_vm4, %v877_v56, 0 }
 0x342   : > { %1285 = vmatprep.subr.bf16.mxu0 %v1383_v2 }
 0x343   : > { %v767_v27 = vpop.permute.xlu0 %766 }
 0x346   : > { %v1359_v59 = vpop.eup %1358 }
 0x347   : > { %v617_v60 = vsel %vm451_vm2, %v1359_v59, 0.0 }
 0x348   : > { %618 = vadd.xlane.f32.xlu1 %v617_v60 }
 0x359   : > { %624 = vrot.lane.b32.xlu1 %v1520_v57, %s1385_s14  ;;  %s273_s14 = scalar_lea.vmem %s1626_s7, %s1185_s10 }
 0x362   : > { %v506_v61 = vpop.xlane.xlu1 %505 }
 0x363   : > { %1360 = vrcp.f32 %v506_v61 }
 0x36d   : > { %v1361_v62 = vpop.eup %1360 }
 0x36e   : > { %v508_v63 = vmul.f32 %v1361_v62, %v1357_v46 }
 0x370   : > { %v509_v0 = vpack.c.bf16 %v508_v63, %v508_v63 }
 0x372   : > { %1276 = vmatmul.mubr.msk.bf16.vlgmr.msra.gmra.mrb[8].mxu0 %vm451_vm2, %v509_v0 }
 0x373   : > { %1287 = vmatprep.mubr.msk.bf16.mxu0 %vm1384_vm0, %v1383_v2 }
 0x3d5   : > { %v619_v5 = vpop.xlane.xlu1 %618 }
 0x3d6   : > { %1362 = vrcp.f32 %v619_v5 }
 0x3d9   : > { %v625_v6 = vpop.permute.xlu1 %624 }
 0x3da   : > { %v630_v7 = vsel %vm513_vm4, %v625_v6, 0 }
 0x3db   : > { %1286 = vmatpush3.bf16.msra.mxu0 %v630_v7 }
 0x3dc   : > { %1297 = vmatprep.subr.bf16.mxu0 %v1383_v2 }
 0x3e0   : > { %v1363_v8 = vpop.eup %1362 }
 0x3e1   : > { %v621_v10 = vmul.f32 %v1363_v8, %v1359_v59 }
 0x3e3   : > { %v622_v11 = vpack.c.bf16 %v621_v10, %v621_v10 }
 0x3e5   : > { %1288 = vmatmul.mubr.msk.bf16.vlgmr.msra.gmra.mrb[12].mxu0 %vm451_vm2, %v622_v11 }
 0x3e6   : > { %1298 = vmatpush3.bf16.msra.mxu0 %v724_v12  ;;  %1299 = vmatprep.mubr.msk.bf16.mxu0 %vm1384_vm0, %v1383_v2 }
 0x3e7   : > { %1309 = vmatprep.subr.bf16.mxu0 %v1383_v2 }
 0x445   : > { %v551_v14 = vpop.f32.mrb[8].mxu0 }
 0x446   : > { %v557_v15 = vpack.c.bf16 %v551_v14, %v551_v14  ;;  %v1277_v16 = vpop.f32.mrb[9].mxu0  ;;  %v1036_v14 = vld [vmem:[%s1622_s3 + $0xc] sm:$0xf] }
 0x447   : > { %v554_v17 = vpop.f32.mrb[10].mxu0 }
 0x448   : > { %v1278_v18 = vpop.f32.mrb[11].mxu0  ;;  %1300 = vmatmul.mubr.msk.bf16.vlgmr.msra.gmra.mrb[16].mxu0 %vm451_vm2, %v557_v15  ;;  %v1041_v15 = vsel %vm513_vm4, %v1036_v14, 0 }
 0x449   : > { %1311 = vmatprep.mubr.msk.bf16.mxu0 %vm1384_vm0, %v1383_v2 }
 0x4b8   : > { %v666_v21 = vpop.f32.mrb[12].mxu0 }
 0x4b9   : > { %v672_v22 = vpack.c.bf16 %v666_v21, %v666_v21  ;;  %v1289_v23 = vpop.f32.mrb[13].mxu0 }
 0x4ba   : > { %v669_v24 = vpop.f32.mrb[14].mxu0 }
 0x4bb   : > { %v1290_v26 = vpop.f32.mrb[15].mxu0  ;;  %1294 = vmatmul.mubr.msk.bf16.vlgmr.msra.gmra.mrb[12].mxu1 %vm451_vm2, %v672_v22 }
 0x4bc   : > { %1304 = vmatpush3.bf16.xpose.msra.mxu1 %v774_v25  ;;  %1305 = vmatprep.mubr.msk.bf16.mxu1 %vm1384_vm0, %v1383_v2 }
 0x4bd   : > { %1315 = vmatprep.subr.bf16.mxu1 %v1383_v2 }
 0x4c3   : > { %1306 = vmatmul.mubr.msk.bf16.vlgmr.msra.gmra.mrb[16].mxu1 %vm451_vm2, %v767_v27 }
 0x4c4   : > { %1317 = vmatprep.mubr.msk.bf16.mxu1 %vm1384_vm0, %v1383_v2  ;;  %1316 = vmatpush3.bf16.msra.mxu1 %v882_v58 }
 0x4c5   : > { %1327 = vmatprep.subr.bf16.mxu1 %v1383_v2 }
 0x51b   : > { %v760_v28 = vpop.f32.mrb[16].mxu0 }
 0x51c   : > { %v1301_v29 = vpop.f32.mrb[17].mxu0 }
 0x51d   : > { %v763_v31 = vpop.f32.mrb[18].mxu0 }
 0x51e   : > { %v1302_v32 = vpop.f32.mrb[19].mxu0 }
 0x51f   : > { %v1205_v32 = vld [vmem:[%s1623_s4] ss:$0 sm:$0xff] }
 0x58e   : > { %v714_v33 = vpop.f32.mrb[12].mxu1 }
 0x58f   : > { %v1557_v34 = vadd.f32 %v760_v28, %v714_v33  ;;  %v1295_v35 = vpop.f32.mrb[13].mxu1 }
 0x590   : > { %v717_v36 = vpop.f32.mrb[14].mxu1  ;;  %v1092_v35 = vunpack.c.l.bf16 %v1465_v4 }
 0x591   : > { %v1296_v37 = vpop.f32.mrb[15].mxu1 }
 0x596   : > { %v810_v38 = vpop.f32.mrb[16].mxu1 }
 0x597   : > { %v811_v39 = vadd.f32 %v810_v38, %v1507_v30  ;;  %v1307_v40 = vpop.f32.mrb[17].mxu1 }
 0x598   : > { %v813_v41 = vpop.f32.mrb[18].mxu1 }
 0x599   : > { %v1308_v42 = vpop.f32.mrb[19].mxu1  ;;  %v816_v43 = vsel %vm451_vm2, %v811_v39, -inf }
 0x59a   : > { %817 = vmax.xlane.f32.xlu1 %v816_v43 }
 0x5ab   : > { %927 = vrot.lane.b32.xlu1 %v1483_v19, %s1388_s21 }
 0x5af   : > { %925 = vrot.lane.b32.xlu1 %v1478_v13, %s1388_s21 }
 0x627   : > { %v818_v44 = vpop.xlane.xlu1 %817 }
 0x628   : > { %v819_v45 = vsub.f32 %v811_v39, %v818_v44 }
 0x62a   : > { %v820_v46 = vmul.f32 1.442695, %v819_v45 }
 0x62b   : > { %v928_v52 = vpop.permute.xlu1 %927 }
 0x62c   : > { %1364 = vpow2.f32 %v820_v46  ;;  %v933_v54 = vsel %vm451_vm2, %v928_v52, 0 }
 0x62f   : > { %v926_v55 = vpop.permute.xlu1 %925 }
 0x636   : > { %v1365_v47 = vpop.eup %1364 }
 0x637   : > { %v822_v48 = vsel %vm451_vm2, %v1365_v47, 0.0 }
 0x638   : > { %823 = vadd.xlane.f32.xlu0 %v822_v48 }
 0x64e   : > { %828 = vrot.lane.b32.xlu0 %v1520_v57, %s1387_s16 }
 0x6c5   : > { %v824_v49 = vpop.xlane.xlu0 %823 }
 0x6c6   : > { %1366 = vrcp.f32 %v824_v49  ;;  %v1206_v49 = vld [vmem:[%s1624_s5] ss:$0 sm:$0xff] }
 0x6c9   : > { %v829_v50 = vpop.permute.xlu0 %828 }
 0x6ca   : > { %v834_v51 = vsel %vm513_vm4, %v829_v50, 0 }
 0x6cb   : > { %1310 = vmatpush3.bf16.msra.mxu0 %v834_v51  ;;  %v1207_v51 = vld [vmem:[%s1625_s6] ss:$0 sm:$0xff] }
 0x6cc   : > { %1321 = vmatprep.subr.bf16.mxu0 %v1383_v2 }
 0x6d0   : > { %v1367_v13 = vpop.eup %1366 }
 0x6d1   : > { %v826_v19 = vmul.f32 %v1367_v13, %v1365_v47 }
 0x6d3   : > { %v827_v53 = vpack.c.bf16 %v826_v19, %v826_v19 }
 0x6d5   : > { %1312 = vmatmul.mubr.msk.bf16.vlgmr.msra.gmra.mrb[20].mxu0 %vm451_vm2, %v827_v53 }
 0x6d6   : > { %1322 = vmatpush3.bf16.xpose.msra.mxu0 %v933_v54  ;;  %1323 = vmatprep.mubr.msk.bf16.mxu0 %vm1384_vm0, %v1383_v2 }
 0x6d7   : > { %1333 = vmatprep.subr.bf16.mxu0 %v1383_v2 }
 0x6dd   : > { %1324 = vmatmul.mubr.msk.bf16.vlgmr.msra.gmra.mrb[24].mxu0 %vm451_vm2, %v926_v55 }
 0x6de   : > { %1335 = vmatprep.mubr.msk.bf16.mxu0 %vm1384_vm0, %v1383_v2  ;;  %1334 = vmatpush3.bf16.msra.mxu0 %v1041_v15 }
 0x7a8   : > { %v870_v59 = vpop.f32.mrb[20].mxu0 }
 0x7a9   : > { %v876_v60 = vpack.c.bf16 %v870_v59, %v870_v59  ;;  %v1313_v61 = vpop.f32.mrb[21].mxu0 }
 0x7aa   : > { %v873_v62 = vpop.f32.mrb[22].mxu0 }
 0x7ab   : > { %v1314_v63 = vpop.f32.mrb[23].mxu0  ;;  %1318 = vmatmul.mubr.msk.bf16.vlgmr.msra.gmra.mrb[20].mxu1 %vm451_vm2, %v876_v60 }
 0x7ac   : > { %1329 = vmatprep.mubr.msk.bf16.mxu1 %vm1384_vm0, %v1383_v2 }
 0x7b0   : > { %v969_v0 = vpop.f32.mrb[24].mxu0 }
 0x7b1   : > { %v970_v1 = vadd.f32 %v969_v0, %v1507_v30  ;;  %v1325_v3 = vpop.f32.mrb[25].mxu0 }
 0x7b2   : > { %v972_v5 = vpop.f32.mrb[26].mxu0 }
 0x7b3   : > { %v1326_v6 = vpop.f32.mrb[27].mxu0  ;;  %v975_v7 = vsel %vm451_vm2, %v970_v1, -inf }
 0x7b4   : > { %976 = vmax.xlane.f32.xlu0 %v975_v7 }
 0x7ca   : > { %987 = vrot.lane.b32.xlu0 %v1520_v57, %s1388_s21 }
 0x841   : > { %v977_v8 = vpop.xlane.xlu0 %976 }
 0x842   : > { %v978_v9 = vsub.f32 %v970_v1, %v977_v8 }
 0x844   : > { %v979_v10 = vmul.f32 1.442695, %v978_v9 }
 0x845   : > { %v988_v11 = vpop.permute.xlu0 %987 }
 0x846   : > { %1368 = vpow2.f32 %v979_v10  ;;  %v993_v12 = vsel %vm513_vm4, %v988_v11, 0 }
 0x847   : > { %1328 = vmatpush3.bf16.msra.mxu1 %v993_v12 }
 0x850   : > { %v1369_v2 = vpop.eup %1368 }
 0x851   : > { %v981_v30 = vsel %vm451_vm2, %v1369_v2, 0.0 }
 0x852   : > { %982 = vadd.xlane.f32.xlu1 %v981_v30 }
 0x87e   : > { %v918_v57 = vpop.f32.mrb[20].mxu1 }
 0x87f   : > { %v924_v16 = vadd.f32 %v918_v57, %v1557_v34  ;;  %v1319_v17 = vpop.f32.mrb[21].mxu1 }
 0x880   : > { %v921_v18 = vpop.f32.mrb[22].mxu1 }
 0x881   : > { %v1320_v20 = vpop.f32.mrb[23].mxu1 }
 0x8df   : > { %v983_v21 = vpop.xlane.xlu1 %982 }
 0x8e0   : > { %1370 = vrcp.f32 %v983_v21 }
 0x8ea   : > { %v1371_v22 = vpop.eup %1370 }
 0x8eb   : > { %v985_v23 = vmul.f32 %v1371_v22, %v1369_v2 }
 0x8ed   : > { %v986_v24 = vpack.c.bf16 %v985_v23, %v985_v23 }
 0x8ef   : > { %1330 = vmatmul.mubr.msk.bf16.vlgmr.msra.gmra.mrb[24].mxu1 %vm451_vm2, %v986_v24 }
 0x9c2   : > { %v1029_v25 = vpop.f32.mrb[24].mxu1 }
 0x9c3   : > { %v1035_v26 = vpack.c.bf16 %v1029_v25, %v1029_v25  ;;  %v1331_v27 = vpop.f32.mrb[25].mxu1 }
 0x9c4   : > { %v1032_v28 = vpop.f32.mrb[26].mxu1 }
 0x9c5   : > { %v1332_v29 = vpop.f32.mrb[27].mxu1  ;;  %1336 = vmatmul.mubr.msk.bf16.vlgmr.msra.gmra.mrb[28].mxu0 %vm451_vm2, %v1035_v26 }
 0xa98   : > { %v1077_v31 = vpop.f32.mrb[28].mxu0 }
 0xa99   : > { %v1083_v33 = vadd.f32 %v1077_v31, %v924_v16  ;;  %v1337_v34 = vpop.f32.mrb[29].mxu0 }
 0xa9a   : > { %v1080_v36 = vpop.f32.mrb[30].mxu0 }
 0xa9b   : > { %v1091_v37 = vadd.f32 %v1205_v32, %v1083_v33  ;;  %v1338_v38 = vpop.f32.mrb[31].mxu0 }
 0xa9d   : > { %v1093_v39 = vadd.f32 %v1092_v35, %v1091_v37 }
 0xa9f   : > { %v1094_v40 = vsel %vm299_vm1, %v1093_v39, 0.0 }
 0xaa0   : > { %1095 = vadd.xlane.f32.xlu1 %v1094_v40 }
 0xb2d   : > { %v1096_v41 = vpop.xlane.xlu1 %1095 }
 0xb2e   : > { %v1098_v42 = vmul.f32 0.03125, %v1096_v41 }
 0xb30   : > { %v1099_v43 = vsub.f32 %v1093_v39, %v1098_v42 }
 0xb32   : > { %v1100_v44 = vmul.f32 %v1099_v43, %v1099_v43 }
 0xb34   : > { %v1101_v45 = vsel %vm299_vm1, %v1100_v44, 0.0 }
 0xb35   : > { %1102 = vadd.xlane.f32.xlu1 %v1101_v45 }
 0xbc2   : > { %v1103_v46 = vpop.xlane.xlu1 %1102 }
 0xbc3   : > { %v1104_v47 = vmul.f32 0.03125, %v1103_v46 }
 0xbc5   : > { %v1105_v48 = vadd.f32 1e-05, %v1104_v47 }
 0xbc7   : > { %1372 = vrsqrt.f32 %v1105_v48 }
 0xbd1   : > { %v1373_v4 = vpop.eup %1372 }
 0xbd2   : > { %v1107_v50 = vmul.f32 %v1373_v4, %v1099_v43 }
 0xbd4   : > { %v1115_v13 = vmul.f32 %v1206_v49, %v1107_v50 }
 0xbd6   : > { %v1123_v19 = vadd.f32 %v1207_v51, %v1115_v13 }
 0xbd8   : > { %v1124_v52 = vpack.c.bf16 %v1123_v19, %v1123_v19 }
 0xbda   : > { %1126 = vst.msk [vmem:[%s273_s14] sm:$0xf] %vm1125_vm5, %v1124_v52 }
 0xbdb PF: > { %s17_s24 = sadd.s32 1, %s1380_s24  }
 0xbdc   : > { %p14_p4 = scmp.ge.s32.totalorder %s17_s24, 4  }
 0xbde   :  { %16 = sbr.rel (!%p14_p4) target bundleno = 1 (0x1), region = 78 }

// kernel: _decoder_forward.8
= control target key start
LH: loop header
LB: loop body
LE: loop exit
PB: predicated region body
PF: predicated region fallthrough
CT: control target
= control target key end

     0   :  { %s1587_s13 = smov 0   ;;  %s1776_s0 = inlined_call_operand.vmem [shape: bf16[2,8,32], index: 0, kind: input, shape index: {}]   ;;  %s1777_s1 = inlined_call_operand.vmem [shape: bf16[2,10,32], index: 1, kind: input, shape index: {}]   ;;  %s1778_s2 = inlined_call_operand.vmem [shape: bf16[32,32], index: 2, kind: input, shape index: {}]   ;;  %s1779_s3 = inlined_call_operand.vmem [shape: f32[1,32], index: 3, kind: input, shape index: {}]   ;;  %s1780_s4 = inlined_call_operand.vmem [shape: bf16[32,64], index: 4, kind: input, shape index: {}]   ;;  %s1781_s5 = inlined_call_operand.vmem [shape: f32[1,64], index: 5, kind: input, shape index: {}]   ;;  %s1782_s6 = inlined_call_operand.vmem [shape: bf16[32,32], index: 6, kind: input, shape index: {}]   ;;  %s1783_s7 = inlined_call_operand.vmem [shape: f32[1,32], index: 7, kind: input, shape index: {}]   ;;  %s1784_s8 = inlined_call_operand.vmem [shape: f32[1,32], index: 8, kind: input, shape index: {}]   ;;  %s1785_s9 = inlined_call_operand.vmem [shape: f32[1,32], index: 9, kind: input, shape index: {}]   ;;  %s1786_s10 = inlined_call_operand.vmem [shape: bf16[2,8,32], index: 10, kind: output, shape index: {}]  }
   0x1 LB: > { %s1315_s14 = sadd.s32 4294967295, %s1524_s13   ;;  %p1319_p0 = scmp.ge.s32.totalorder %s1524_s13, 1  ;;  %s1524_s13 = sphi %s1587_s13, %s20_s13  }
   0x2   : > { %p321_p1 = scmp.lt.s32.totalorder %s1524_s13, 3 }
   0x4   : > { %p322_p2 = pnand %p1319_p0, %p321_p1 }
   0x5   : > { %v1495_v0 = vld [vmem:[%s1780_s4] sm:$0xff] (!%p322_p2)   ;;  %v1526_v1 = vmov (!%p322_p2), 0.0   ;;  %v1496_v2 = vld [vmem:[%s1780_s4 + $0x8] sm:$0xff] (!%p322_p2)   ;;  %vm1527_vm0 = vmmov (!%p322_p2), 0   ;;  %p362_p3 = scmp.lt.s32.totalorder (!%p322_p2), %s1315_s14, 1  ;;  %vm402_vm1 = vcmask (!%p322_p2), 261120  }
   0x6   : > { %325 = sbr.rel (%p322_p2) target bundleno = 2920 (0xb68), region = 60  ;;  %1393 = vmatprep.subr.bf16.mxu1 (!%p322_p2), %v1526_v1  ;;  %1385 = vmatprep.subr.bf16.mxu0 (!%p322_p2), %v1526_v1  ;;  %v1497_v3 = vld [vmem:[%s1778_s2] sm:$0xff] (!%p322_p2)   ;;  %v1499_v4 = vld [vmem:[%s1778_s2 + $0x8] sm:$0xff] (!%p322_p2)   ;;  %s1528_s17 = smov (!%p322_p2), 96   ;;  %vm572_vm2 = vcmask (!%p322_p2), 64512   ;;  %vm619_vm3 = vcmask (!%p322_p2), 80896  }
   0x7   : > { %1394 = vmatpush3.bf16.msra.mxu1 (!%p322_p2), %v1495_v0  ;;  %1397 = vmatprep.mubr.msk.bf16.mxu1 (!%p322_p2), %vm1527_vm0, %v1526_v1  ;;  %v1324_v7 = vld [vmem:[%s1779_s3] ss:$0 sm:$0xff] (!%p322_p2)  ;;  %s1529_s18 = smov (!%p322_p2), 120   ;;  %s1530_s19 = smov (!%p322_p2), 112   ;;  %vm635_vm4 = vcmask (!%p322_p2), 1044480   ;;  %vm799_vm5 = vcmask (!%p322_p2), 1043456  }
   0x8   : > { %1395 = vmatprep.subr.bf16.mxu1 (!%p322_p2), %v1526_v1  ;;  %1389 = vmatprep.mubr.msk.bf16.mxu0 (!%p322_p2), %vm1527_vm0, %v1526_v1  ;;  %v1328_v8 = vld [vmem:[%s1781_s5] ss:$0 sm:$0xff] (!%p322_p2)  ;;  %v795_v62 = vld [vmem:[%s1782_s6 + $0x4] sm:$0xf] (!%p322_p2)  ;;  %s1531_s25 = smov (!%p322_p2), 104   ;;  %vm1248_vm6 = vcmask (!%p322_p2), 257024  }
   0x9   : > { %1386 = vmatpush3.bf16.msra.mxu0 (!%p322_p2), %v1497_v3  ;;  %521 = vrot.lane.b32.xlu1 (!%p322_p2), %v1495_v0, %s1528_s17  ;;  %v801_v63 = vsel (!%p322_p2), %vm799_vm5, %v795_v62, 0 }
   0xa   : > { %1387 = vmatprep.subr.bf16.mxu0 (!%p322_p2), %v1526_v1 }
   0xb   : > { %1396 = vmatpush3.bf16.msra.mxu1 (!%p322_p2), %v1496_v2 }
   0xc   : > { %1409 = vmatprep.subr.bf16.mxu1 (!%p322_p2), %v1526_v1 }
   0xd   : > { %s1788_s14 = smov (!%p362_p3, %s1315_s14), 1  ;;  %1388 = vmatpush3.bf16.msra.mxu0 %v1499_v4  ;;  %523 = vrot.lane.b32.xlu1 %v1496_v2, %s1528_s17 }
   0xe   : > { %s1351_s23 = sshll.u32 %s1788_s14, 3  ;;  %s1320_s24 = sshll.u32 %s1788_s14, 2  ;;  %1401 = vmatprep.subr.bf16.mxu0 %v1526_v1 }
   0xf   : > { %s370_s27 = scalar_lea.vmem %s1777_s1, %s1351_s23  ;;  %s365_s30 = scalar_lea.vmem %s1776_s0, %s1320_s24 }
  0x10   : > { %v1498_v5 = vld [vmem:[%s370_s27] sm:$0x1f]   ;;  %s374_s20 = scalar_lea.vmem %s1786_s10, %s1320_s24 }
  0x11   : > { %v1628_v6 = vld [vmem:[%s365_s30] sm:$0xf]  ;;  %1398 = vmatmul.mubr.msk.bf16.vlgmr.msra.gmra.mrb[0].mxu1 %vm402_vm1, %v1498_v5 }
  0x12   : > { %1390 = vmatmul.mubr.msk.bf16.vlgmr.msra.gmra.mrb[0].mxu0 %vm402_vm1, %v1628_v6  ;;  %1411 = vmatprep.mubr.msk.bf16.mxu1 %vm1527_vm0, %v1526_v1 }
  0x13   : > { %1405 = vmatprep.mubr.msk.bf16.mxu0 %vm1527_vm0, %v1526_v1 }
  0x7b   : > { %v522_v27 = vpop.permute.xlu1 %521 }
  0x7c   : > { %1402 = vmatpush3.bf16.msra.mxu0 %v522_v27 }
  0x7d   : > { %1403 = vmatprep.subr.bf16.mxu0 %v1526_v1 }
  0x7f   : > { %v524_v28 = vpop.permute.xlu1 %523 }
  0x80   : > { %1404 = vmatpush3.bf16.msra.mxu0 %v524_v28 }
  0x81   : > { %1415 = vmatprep.subr.bf16.mxu0 %v1526_v1 }
  0x83   : > { %1406 = vmatmul.mubr.msk.bf16.vlgmr.msra.gmra.mrb[4].mxu0 %vm402_vm1, %v1498_v5  ;;  %v680_v5 = vld [vmem:[%s1782_s6] sm:$0xf] }
  0x84   : > { %1417 = vmatprep.mubr.msk.bf16.mxu0 %vm1527_vm0, %v1526_v1 }
  0xe4   : > { %v513_v9 = vpop.f32.mrb[0].mxu1 }
  0xe5   : > { %v1399_v10 = vpop.f32.mrb[1].mxu1  ;;  %v440_v11 = vpop.f32.mrb[0].mxu0  ;;  %v514_v15 = vadd.f32 %v1328_v8, %v513_v9  ;;  %v847_v9 = vsel %vm799_vm5, %v680_v5, 0 }
  0xe6   : > { %v516_v12 = vpop.f32.mrb[2].mxu1  ;;  %v441_v13 = vadd.f32 %v1324_v7, %v440_v11  ;;  %v1391_v14 = vpop.f32.mrb[1].mxu0 }
  0xe7   : > { %v517_v16 = vadd.f32 %v1328_v8, %v516_v12  ;;  %v1400_v17 = vpop.f32.mrb[3].mxu1  ;;  %v443_v18 = vpop.f32.mrb[2].mxu0 }
  0xe8   : > { %v446_v19 = vmul.f32 0.35355338, %v441_v13  ;;  %v1392_v20 = vpop.f32.mrb[3].mxu0 }
  0xe9   : > { %v1645_v21 = vpack.c.bf16 %v517_v16, %v514_v15 }
  0xea   : > { %v1647_v22 = vpack.c.bf16 %v446_v19, %v446_v19 }
  0xeb   : > { %685 = vrot.lane.b32.xlu0 %v1645_v21, %s1529_s18  ;;  %v577_v23 = vsel %vm572_vm2, %v1645_v21, 0 }
  0xec   : > { %1410 = vmatpush3.bf16.xpose.msra.mxu1 %v577_v23 }
  0xed   : > { %1421 = vmatprep.subr.bf16.mxu1 %v1526_v1 }
  0xef   : > { %682 = vrot.lane.b32.xlu0 %v1647_v22, %s1529_s18 }
  0xf3   : > { %1412 = vmatmul.mubr.msk.bf16.vlgmr.msra.gmra.mrb[4].mxu1 %vm572_vm2, %v1647_v22 }
  0xf4   : > { %1423 = vmatprep.mubr.msk.bf16.mxu1 %vm1527_vm0, %v1526_v1 }
 0x156   : > { %v564_v42 = vpop.f32.mrb[4].mxu0 }
 0x157   : > { %v1407_v43 = vpop.f32.mrb[5].mxu0 }
 0x158   : > { %v567_v48 = vpop.f32.mrb[6].mxu0 }
 0x159   : > { %v1408_v49 = vpop.f32.mrb[7].mxu0 }
 0x15d   : > { %v686_v24 = vpop.permute.xlu0 %685 }
 0x15e   : > { %v691_v25 = vsel %vm572_vm2, %v686_v24, 0 }
 0x15f   : > { %1422 = vmatpush3.bf16.xpose.msra.mxu1 %v691_v25 }
 0x160   : > { %1433 = vmatprep.subr.bf16.mxu1 %v1526_v1 }
 0x161   : > { %v683_v26 = vpop.permute.xlu0 %682 }
 0x166   : > { %1424 = vmatmul.mubr.msk.bf16.vlgmr.msra.gmra.mrb[8].mxu1 %vm572_vm2, %v683_v26 }
 0x167   : > { %1435 = vmatprep.mubr.msk.bf16.mxu1 %vm1527_vm0, %v1526_v1  ;;  %1434 = vmatpush3.bf16.msra.mxu1 %v801_v63 }
 0x168   : > { %1445 = vmatprep.subr.bf16.mxu1 %v1526_v1 }
 0x1c6   : > { %v613_v29 = vpop.f32.mrb[4].mxu1 }
 0x1c7   : > { %v1413_v30 = vpop.f32.mrb[5].mxu1  ;;  %v620_v31 = vsel %vm619_vm3, %v613_v29, -inf }
 0x1c8   : > { %621 = vmax.xlane.f32.xlu0 %v620_v31  ;;  %v616_v32 = vpop.f32.mrb[6].mxu1 }
 0x1c9   : > { %v1414_v33 = vpop.f32.mrb[7].mxu1 }
 0x1de   : > { %527 = vrot.lane.b32.xlu0 %v1328_v8, %s1528_s17 }
 0x1e2   : > { %891 = vrot.lane.b32.xlu0 %v1645_v21, %s1530_s19 }
 0x1e6   : > { %889 = vrot.lane.b32.xlu0 %v1647_v22, %s1530_s19 }
 0x239   : > { %v727_v34 = vpop.f32.mrb[8].mxu1 }
 0x23a   : > { %v1425_v35 = vpop.f32.mrb[9].mxu1  ;;  %v733_v36 = vsel %vm619_vm3, %v727_v34, -inf }
 0x23b   : > { %734 = vmax.xlane.f32.xlu1 %v733_v36  ;;  %v730_v37 = vpop.f32.mrb[10].mxu1 }
 0x23c   : > { %v1426_v38 = vpop.f32.mrb[11].mxu1 }
 0x255   : > { %v622_v39 = vpop.xlane.xlu0 %621 }
 0x256   : > { %v623_v40 = vsub.f32 %v613_v29, %v622_v39 }
 0x258   : > { %v624_v41 = vmul.f32 1.442695, %v623_v40 }
 0x259   : > { %v528_v46 = vpop.permute.xlu0 %527 }
 0x25a   : > { %1500 = vpow2.f32 %v624_v41  ;;  %v565_v47 = vadd.f32 %v564_v42, %v528_v46  ;;  %v568_v50 = vadd.f32 %v567_v48, %v528_v46 }
 0x25c   : > { %v1679_v51 = vpack.c.bf16 %v568_v50, %v565_v47 }
 0x25d   : > { %v892_v15 = vpop.permute.xlu0 %891 }
 0x25e   : > { %v637_v52 = vsel %vm635_vm4, %v1679_v51, 0  ;;  %v897_v20 = vsel %vm572_vm2, %v892_v15, 0 }
 0x25f   : > { %1416 = vmatpush3.bf16.msra.mxu0 %v637_v52 }
 0x260   : > { %1427 = vmatprep.subr.bf16.mxu0 %v1526_v1 }
 0x261   : > { %v890_v24 = vpop.permute.xlu0 %889 }
 0x264   : > { %v1501_v44 = vpop.eup %1500 }
 0x265   : > { %v626_v45 = vsel %vm619_vm3, %v1501_v44, 0.0 }
 0x266   : > { %627 = vadd.xlane.f32.xlu1 %v626_v45 }
 0x2c8   : > { %v735_v53 = vpop.xlane.xlu1 %734 }
 0x2c9   : > { %v736_v54 = vsub.f32 %v727_v34, %v735_v53 }
 0x2cb   : > { %v737_v55 = vmul.f32 1.442695, %v736_v54 }
 0x2cd   : > { %1502 = vpow2.f32 %v737_v55 }
 0x2d7   : > { %v1503_v56 = vpop.eup %1502 }
 0x2d8   : > { %v739_v57 = vsel %vm619_vm3, %v1503_v56, 0.0 }
 0x2d9   : > { %740 = vadd.xlane.f32.xlu1 %v739_v57 }
 0x2ea   : > { %746 = vrot.lane.b32.xlu1 %v1679_v51, %s1529_s18 }
 0x2f3   : > { %v628_v58 = vpop.xlane.xlu1 %627 }
 0x2f4   : > { %1504 = vrcp.f32 %v628_v58 }
 0x2fe   : > { %v1505_v59 = vpop.eup %1504 }
 0x2ff   : > { %v630_v60 = vmul.f32 %v1505_v59, %v1501_v44 }
 0x301   : > { %v631_v61 = vpack.c.bf16 %v630_v60, %v630_v60 }
 0x303   : > { %1418 = vmatmul.mubr.msk.bf16.vlgmr.msra.gmra.mrb[8].mxu0 %vm619_vm3, %v631_v61 }
 0x304   : > { %1429 = vmatprep.mubr.msk.bf16.mxu0 %vm1527_vm0, %v1526_v1 }
 0x366   : > { %v741_v0 = vpop.xlane.xlu1 %740 }
 0x367   : > { %1506 = vrcp.f32 %v741_v0 }
 0x36a   : > { %v747_v2 = vpop.permute.xlu1 %746 }
 0x36b   : > { %v752_v3 = vsel %vm635_vm4, %v747_v2, 0 }
 0x36c   : > { %1428 = vmatpush3.bf16.msra.mxu0 %v752_v3 }
 0x36d   : > { %1439 = vmatprep.subr.bf16.mxu0 %v1526_v1 }
 0x371   : > { %v1507_v4 = vpop.eup %1506 }
 0x372   : > { %v743_v7 = vmul.f32 %v1507_v4, %v1503_v56 }
 0x374   : > { %v744_v8 = vpack.c.bf16 %v743_v7, %v743_v7 }
 0x376   : > { %1430 = vmatmul.mubr.msk.bf16.vlgmr.msra.gmra.mrb[12].mxu0 %vm619_vm3, %v744_v8 }
 0x377   : > { %1440 = vmatpush3.bf16.msra.mxu0 %v847_v9  ;;  %1441 = vmatprep.mubr.msk.bf16.mxu0 %vm1527_vm0, %v1526_v1 }
 0x378   : > { %1451 = vmatprep.subr.bf16.mxu0 %v1526_v1 }
 0x3d6   : > { %v673_v10 = vpop.f32.mrb[8].mxu0 }
 0x3d7   : > { %v679_v11 = vpack.c.bf16 %v673_v10, %v673_v10  ;;  %v1419_v12 = vpop.f32.mrb[9].mxu0 }
 0x3d8   : > { %v676_v13 = vpop.f32.mrb[10].mxu0 }
 0x3d9   : > { %v1420_v14 = vpop.f32.mrb[11].mxu0  ;;  %1442 = vmatmul.mubr.msk.bf16.vlgmr.msra.gmra.mrb[16].mxu0 %vm572_vm2, %v679_v11 }
 0x3da   : > { %1453 = vmatprep.mubr.msk.bf16.mxu0 %vm1527_vm0, %v1526_v1 }
 0x449   : > { %v788_v16 = vpop.f32.mrb[12].mxu0 }
 0x44a   : > { %v794_v17 = vpack.c.bf16 %v788_v16, %v788_v16  ;;  %v1431_v18 = vpop.f32.mrb[13].mxu0 }
 0x44b   : > { %v791_v19 = vpop.f32.mrb[14].mxu0 }
 0x44c   : > { %v1432_v23 = vpop.f32.mrb[15].mxu0  ;;  %1436 = vmatmul.mubr.msk.bf16.vlgmr.msra.gmra.mrb[12].mxu1 %vm572_vm2, %v794_v17 }
 0x44d   : > { %1446 = vmatpush3.bf16.xpose.msra.mxu1 %v897_v20  ;;  %1447 = vmatprep.mubr.msk.bf16.mxu1 %vm1527_vm0, %v1526_v1 }
 0x44e   : > { %1457 = vmatprep.subr.bf16.mxu1 %v1526_v1 }
 0x454   : > { %1448 = vmatmul.mubr.msk.bf16.vlgmr.msra.gmra.mrb[16].mxu1 %vm572_vm2, %v890_v24 }
 0x455   : > { %1459 = vmatprep.mubr.msk.bf16.mxu1 %vm1527_vm0, %v1526_v1 }
 0x4ac   : > { %v883_v25 = vpop.f32.mrb[16].mxu0 }
 0x4ad   : > { %v1443_v26 = vpop.f32.mrb[17].mxu0 }
 0x4ae   : > { %v886_v27 = vpop.f32.mrb[18].mxu0  ;;  %v1346_v26 = vld [vmem:[%s1783_s7] ss:$0 sm:$0xff] }
 0x4af   : > { %v1444_v28 = vpop.f32.mrb[19].mxu0 }
 0x51f   : > { %v837_v29 = vpop.f32.mrb[12].mxu1 }
 0x520   : > { %v1716_v30 = vadd.f32 %v883_v25, %v837_v29  ;;  %v1437_v31 = vpop.f32.mrb[13].mxu1  ;;  %v1215_v29 = vunpack.c.l.bf16 %v1628_v6 }
 0x521   : > { %v840_v32 = vpop.f32.mrb[14].mxu1 }
 0x522   : > { %v1438_v33 = vpop.f32.mrb[15].mxu1 }
 0x527   : > { %v933_v34 = vpop.f32.mrb[16].mxu1 }
 0x528   : > { %v1449_v35 = vpop.f32.mrb[17].mxu1  ;;  %v939_v36 = vsel %vm619_vm3, %v933_v34, -inf }
 0x529   : > { %940 = vmax.xlane.f32.xlu0 %v939_v36  ;;  %v936_v37 = vpop.f32.mrb[18].mxu1 }
 0x52a   : > { %v1450_v38 = vpop.f32.mrb[19].mxu1 }
 0x53f   : > { %951 = vrot.lane.b32.xlu0 %v1679_v51, %s1530_s19 }
 0x543   : > { %1048 = vrot.lane.b32.xlu0 %v1647_v22, %s1531_s25 }
 0x5b6   : > { %v941_v39 = vpop.xlane.xlu0 %940 }
 0x5b7   : > { %v942_v40 = vsub.f32 %v933_v34, %v941_v39 }
 0x5b9   : > { %v943_v41 = vmul.f32 1.442695, %v942_v40 }
 0x5ba   : > { %v952_v42 = vpop.permute.xlu0 %951 }
 0x5bb   : > { %1508 = vpow2.f32 %v943_v41  ;;  %v957_v43 = vsel %vm635_vm4, %v952_v42, 0 }
 0x5bc   : > { %1452 = vmatpush3.bf16.msra.mxu0 %v957_v43  ;;  %v1347_v43 = vld [vmem:[%s1784_s8] ss:$0 sm:$0xff] }
 0x5bd   : > { %1463 = vmatprep.subr.bf16.mxu0 %v1526_v1 }
 0x5be   : > { %v1049_v52 = vpop.permute.xlu0 %1048 }
 0x5c5   : > { %v1509_v44 = vpop.eup %1508 }
 0x5c6   : > { %v945_v45 = vsel %vm619_vm3, %v1509_v44, 0.0 }
 0x5c7   : > { %946 = vadd.xlane.f32.xlu1 %v945_v45  ;;  %v1348_v45 = vld [vmem:[%s1785_s9] ss:$0 sm:$0xff] }
 0x5d8   : > { %1050 = vrot.lane.b32.xlu1 %v1645_v21, %s1531_s25  ;;  %v1000_v21 = vld [vmem:[%s1782_s6 + $0x8] sm:$0xf] }
 0x5d9   : > { %v1005_v53 = vsel %vm799_vm5, %v1000_v21, 0 }
 0x5da   : > { %1458 = vmatpush3.bf16.msra.mxu1 %v1005_v53 }
 0x5db   : > { %1469 = vmatprep.subr.bf16.mxu1 %v1526_v1 }
 0x654   : > { %v947_v46 = vpop.xlane.xlu1 %946 }
 0x655   : > { %1510 = vrcp.f32 %v947_v46 }
 0x658   : > { %v1051_v48 = vpop.permute.xlu1 %1050 }
 0x659   : > { %v1056_v50 = vsel %vm572_vm2, %v1051_v48, 0 }
 0x65f   : > { %v1511_v22 = vpop.eup %1510 }
 0x660   : > { %v949_v47 = vmul.f32 %v1511_v22, %v1509_v44 }
 0x662   : > { %v950_v49 = vpack.c.bf16 %v949_v47, %v949_v47 }
 0x664   : > { %1454 = vmatmul.mubr.msk.bf16.vlgmr.msra.gmra.mrb[20].mxu0 %vm619_vm3, %v950_v49 }
 0x665   : > { %1464 = vmatpush3.bf16.xpose.msra.mxu0 %v1056_v50  ;;  %1465 = vmatprep.mubr.msk.bf16.mxu0 %vm1527_vm0, %v1526_v1 }
 0x666   : > { %1475 = vmatprep.subr.bf16.mxu0 %v1526_v1 }
 0x66c   : > { %1466 = vmatmul.mubr.msk.bf16.vlgmr.msra.gmra.mrb[24].mxu0 %vm572_vm2, %v1049_v52 }
 0x66d   : > { %1477 = vmatprep.mubr.msk.bf16.mxu0 %vm1527_vm0, %v1526_v1 }
 0x737   : > { %v993_v54 = vpop.f32.mrb[20].mxu0 }
 0x738   : > { %v999_v55 = vpack.c.bf16 %v993_v54, %v993_v54  ;;  %v1455_v56 = vpop.f32.mrb[21].mxu0 }
 0x739   : > { %v996_v57 = vpop.f32.mrb[22].mxu0 }
 0x73a   : > { %v1456_v58 = vpop.f32.mrb[23].mxu0  ;;  %1460 = vmatmul.mubr.msk.bf16.vlgmr.msra.gmra.mrb[20].mxu1 %vm572_vm2, %v999_v55 }
 0x73b   : > { %1471 = vmatprep.mubr.msk.bf16.mxu1 %vm1527_vm0, %v1526_v1  ;;  %v1159_v1 = vld [vmem:[%s1782_s6 + $0xc] sm:$0xf] }
 0x73c   : > { %v1164_v7 = vsel %vm799_vm5, %v1159_v1, 0 }
 0x73d   : > { %1476 = vmatpush3.bf16.msra.mxu0 %v1164_v7 }
 0x73f   : > { %v1092_v59 = vpop.f32.mrb[24].mxu0 }
 0x740   : > { %v1467_v60 = vpop.f32.mrb[25].mxu0  ;;  %v1098_v61 = vsel %vm619_vm3, %v1092_v59, -inf }
 0x741   : > { %1099 = vmax.xlane.f32.xlu1 %v1098_v61  ;;  %v1095_v62 = vpop.f32.mrb[26].mxu0 }
 0x742   : > { %v1468_v63 = vpop.f32.mrb[27].mxu0 }
 0x7ce   : > { %v1100_v0 = vpop.xlane.xlu1 %1099 }
 0x7cf   : > { %v1101_v2 = vsub.f32 %v1092_v59, %v1100_v0 }
 0x7d1   : > { %v1102_v3 = vmul.f32 1.442695, %v1101_v2 }
 0x7d3   : > { %1512 = vpow2.f32 %v1102_v3 }
 0x7dd   : > { %v1513_v4 = vpop.eup %1512 }
 0x7de   : > { %v1104_v5 = vsel %vm619_vm3, %v1513_v4, 0.0 }
 0x7df   : > { %1105 = vadd.xlane.f32.xlu0 %v1104_v5 }
 0x7f5   : > { %1110 = vrot.lane.b32.xlu0 %v1679_v51, %s1531_s25 }
 0x80d   : > { %v1041_v8 = vpop.f32.mrb[20].mxu1 }
 0x80e   : > { %v1047_v9 = vadd.f32 %v1041_v8, %v1716_v30  ;;  %v1461_v10 = vpop.f32.mrb[21].mxu1 }
 0x80f   : > { %v1044_v11 = vpop.f32.mrb[22].mxu1 }
 0x810   : > { %v1462_v12 = vpop.f32.mrb[23].mxu1 }
 0x86c   : > { %v1106_v13 = vpop.xlane.xlu0 %1105 }
 0x86d   : > { %1514 = vrcp.f32 %v1106_v13 }
 0x870   : > { %v1111_v14 = vpop.permute.xlu0 %1110 }
 0x871   : > { %v1116_v15 = vsel %vm635_vm4, %v1111_v14, 0 }
 0x872   : > { %1470 = vmatpush3.bf16.msra.mxu1 %v1116_v15 }
 0x877   : > { %v1515_v51 = vpop.eup %1514 }
 0x878   : > { %v1108_v16 = vmul.f32 %v1515_v51, %v1513_v4 }
 0x87a   : > { %v1109_v17 = vpack.c.bf16 %v1108_v16, %v1108_v16 }
 0x87c   : > { %1472 = vmatmul.mubr.msk.bf16.vlgmr.msra.gmra.mrb[24].mxu1 %vm619_vm3, %v1109_v17 }
 0x94f   : > { %v1152_v18 = vpop.f32.mrb[24].mxu1 }
 0x950   : > { %v1158_v19 = vpack.c.bf16 %v1152_v18, %v1152_v18  ;;  %v1473_v20 = vpop.f32.mrb[25].mxu1 }
 0x951   : > { %v1155_v23 = vpop.f32.mrb[26].mxu1 }
 0x952   : > { %v1474_v24 = vpop.f32.mrb[27].mxu1  ;;  %1478 = vmatmul.mubr.msk.bf16.vlgmr.msra.gmra.mrb[28].mxu0 %vm572_vm2, %v1158_v19 }
 0xa25   : > { %v1200_v25 = vpop.f32.mrb[28].mxu0 }
 0xa26   : > { %v1206_v27 = vadd.f32 %v1200_v25, %v1047_v9  ;;  %v1479_v28 = vpop.f32.mrb[29].mxu0 }
 0xa27   : > { %v1203_v30 = vpop.f32.mrb[30].mxu0 }
 0xa28   : > { %v1214_v31 = vadd.f32 %v1346_v26, %v1206_v27  ;;  %v1480_v32 = vpop.f32.mrb[31].mxu0 }
 0xa2a   : > { %v1216_v33 = vadd.f32 %v1215_v29, %v1214_v31 }
 0xa2c   : > { %v1217_v34 = vsel %vm402_vm1, %v1216_v33, 0.0 }
 0xa2d   : > { %1218 = vadd.xlane.f32.xlu1 %v1217_v34 }
 0xaba   : > { %v1219_v35 = vpop.xlane.xlu1 %1218 }
 0xabb   : > { %v1221_v36 = vmul.f32 0.03125, %v1219_v35 }
 0xabd   : > { %v1222_v37 = vsub.f32 %v1216_v33, %v1221_v36 }
 0xabf   : > { %v1223_v38 = vmul.f32 %v1222_v37, %v1222_v37 }
 0xac1   : > { %v1224_v39 = vsel %vm402_vm1, %v1223_v38, 0.0 }
 0xac2   : > { %1225 = vadd.xlane.f32.xlu1 %v1224_v39 }
 0xb4f   : > { %v1226_v40 = vpop.xlane.xlu1 %1225 }
 0xb50   : > { %v1227_v41 = vmul.f32 0.03125, %v1226_v40 }
 0xb52   : > { %v1228_v42 = vadd.f32 1e-05, %v1227_v41 }
 0xb54   : > { %1516 = vrsqrt.f32 %v1228_v42 }
 0xb5e   : > { %v1517_v6 = vpop.eup %1516 }
 0xb5f   : > { %v1230_v44 = vmul.f32 %v1517_v6, %v1222_v37 }
 0xb61   : > { %v1238_v46 = vmul.f32 %v1347_v43, %v1230_v44 }
 0xb63   : > { %v1246_v22 = vadd.f32 %v1348_v45, %v1238_v46 }
 0xb65   : > { %v1247_v47 = vpack.c.bf16 %v1246_v22, %v1246_v22 }
 0xb67   : > { %1249 = vst.msk [vmem:[%s374_s20] sm:$0xf] %vm1248_vm6, %v1247_v47 }
 0xb68 PF: > { %s20_s13 = sadd.s32 1, %s1524_s13  }
 0xb69   : > { %p17_p4 = scmp.ge.s32.totalorder %s20_s13, 4  }
 0xb6b   :  { %19 = sbr.rel (!%p17_p4) target bundleno = 1 (0x1), region = 93 }

</bundles_post_ra>
